<compile_context>
chip_gen: v5e
topology: v5e:2x2
jax: 0.10.0
libtpu: 0.0.40
codegen_flags: <defaults>
</compile_context>

<pallas_src>
import numpy as np
import jax
import jax.numpy as jnp
from jax import lax
from jax.experimental import pallas as pl
from jax.experimental.pallas import tpu as pltpu


def _residual_kernel(x_ref, m1_ref, b1_ref, m2_ref, b2_ref,
                     bn0s_ref, bn0b_ref, bn1s_ref, bn1b_ref, gate_ref,
                     o_ref, dbuf_ref):
    D, HWC = x_ref.shape
    k = m1_ref.shape[0]
    p = (k - 1) // 2

    x = x_ref[...]                                            # (D, HWC) lane-dense

    # ---- bn0 (folded, inference mode) + ReLU ---------------------------------
    h0 = jnp.maximum(x * bn0s_ref[...] + bn0b_ref[...], 0.0)

    # ---- zero only the D-halo rows of the scratch (interior overwritten) -----
    zeros_halo = jnp.zeros((p, HWC), jnp.float32)
    dbuf_ref[0:p, :] = zeros_halo
    dbuf_ref[p + D:, :] = zeros_halo

    def conv(m_ref, b_ref, h):
        # 3D conv as k MXU-shaped matmuls against precomputed shift matrices.
        # Operands kept in f32 (keeps the numerics check tight; bf16 cast of the
        # dot operands is a further option on v6e/v7x).
        dbuf_ref[p:p + D, :] = h
        acc = jnp.zeros((D, HWC), jnp.float32)
        for kd in range(k):                                   # static, unrolled
            acc = acc + jnp.dot(dbuf_ref[kd:kd + D, :], m_ref[kd],
                                preferred_element_type=jnp.float32)
        return acc + b_ref[...]

    # ---- conv1 + ReLU --------------------------------------------------------
    out1 = jnp.maximum(conv(m1_ref, b1_ref, h0), 0.0)

    # ---- bn1 + ReLU ----------------------------------------------------------
    h1 = jnp.maximum(out1 * bn1s_ref[...] + bn1b_ref[...], 0.0)

    # ---- conv2 ---------------------------------------------------------------
    out2 = conv(m2_ref, b2_ref, h1)

    # ---- ECA gate: GAP over (D,H,W) -> 3-tap channel conv -> sigmoid ---------
    # gate_ref folds (channel pooling / S) @ ecaM @ (channel->lane broadcast),
    # so the gate stays lane-dense end to end.
    colsum = jnp.sum(out2, axis=0, keepdims=True)             # (1, HWC)
    gate = jax.nn.sigmoid(jnp.dot(colsum, gate_ref[...],
                                  preferred_element_type=jnp.float32))

    # ---- channel gating + residual add; unmasked lane-dense store ------------
    o_ref[...] = out2 * gate + x


def residual_forward(x, kparams):
    """x: (N, D, H, W, C) channels-last; kparams from prepare_kernel_params."""
    (m1, b1t, m2, b2t, bn0s_t, bn0b_t, bn1s_t, bn1b_t, G) = kparams
    N, D, H, W, C = x.shape
    HWC = H * W * C
    k = m1.shape[0]
    p = (k - 1) // 2
    x_flat = x.reshape(N, D, HWC)            # lane-dense: last dim multiple of 128

    def resident(a):
        nd = a.ndim
        return pl.BlockSpec(a.shape, lambda n, _nd=nd: (0,) * _nd)

    grid_spec = pltpu.PrefetchScalarGridSpec(
        num_scalar_prefetch=0,
        grid=(N,),
        in_specs=[
            pl.BlockSpec((None, D, HWC), lambda n: (n, 0, 0)),    # x (per-sample)
            resident(m1), resident(b1t),
            resident(m2), resident(b2t),
            resident(bn0s_t), resident(bn0b_t),
            resident(bn1s_t), resident(bn1b_t),
            resident(G),
        ],
        out_specs=pl.BlockSpec((None, D, HWC), lambda n: (n, 0, 0)),
        scratch_shapes=[pltpu.VMEM((D + 2 * p, HWC), jnp.float32)],
    )
    out_flat = pl.pallas_call(
        _residual_kernel,
        out_shape=jax.ShapeDtypeStruct((N, D, HWC), jnp.float32),
        grid_spec=grid_spec,
        compiler_params=pltpu.CompilerParams(
            dimension_semantics=("parallel",)),     # batch samples independent
    )(x_flat, m1, b1t, m2, b2t, bn0s_t, bn0b_t, bn1s_t, bn1b_t, G)
    return out_flat.reshape(N, D, H, W, C)


def conv_to_shift_matrices(w, H, W, p):
    """Fold a (k,k,k,Cin,Cout) conv kernel (+ zero padding over H,W) into k
    matrices M[kd] of shape (H*W*Cin, H*W*Cout) such that
        out_flat[d] = sum_kd in_flat[d + kd - p] @ M[kd]   (zero rows when OOB)."""
    w = np.asarray(w, np.float32)
    k, _, _, Cin, Cout = w.shape
    M = np.zeros((k, H * W * Cin, H * W * Cout), np.float32)
    for kd in range(k):
        for kh in range(k):
            for kw in range(k):
                for h in range(H):
                    hin = h + kh - p
                    if hin < 0 or hin >= H:
                        continue
                    for wcol in range(W):
                        win = wcol + kw - p
                        if win < 0 or win >= W:
                            continue
                        g = (hin * W + win) * Cin
                        f = (h * W + wcol) * Cout
                        M[kd, g:g + Cin, f:f + Cout] += w[kd, kh, kw]
    return jnp.asarray(M)


def prepare_kernel_params(raw, D, H, W, C, p):
    (w1, b1, w2, b2, bn0s, bn0b, bn1s, bn1b, ecaM) = raw
    HWC = H * W * C
    S = D * H * W
    hw = H * W

    def tile_c(v):
        # per-channel vector -> lane-dense (1, H*W*C) tile (c fastest in flat idx)
        return jnp.tile(jnp.asarray(v, jnp.float32).reshape(C), hw).reshape(1, HWC)

    m1 = conv_to_shift_matrices(w1, H, W, p)
    m2 = conv_to_shift_matrices(w2, H, W, p)

    # ECA: fold (mean over D,H,W per channel) -> 3-tap channel conv ->
    # channel-to-lane broadcast into a single (HWC, HWC) matrix.
    sel = np.zeros((HWC, C), np.float32)
    sel[np.arange(HWC), np.arange(HWC) % C] = 1.0
    G = jnp.asarray(sel / S) @ jnp.asarray(ecaM, jnp.float32) @ jnp.asarray(sel.T)

    return (m1, tile_c(b1), m2, tile_c(b2),
            tile_c(bn0s), tile_c(bn0b), tile_c(bn1s), tile_c(bn1b), G)


def residual_reference(x, raw, p=1):
    (w1, b1, w2, b2, bn0s, bn0b, bn1s, bn1b, ecaM) = raw
    dn = ('NDHWC', 'DHWIO', 'NDHWC')
    C = x.shape[-1]
    h = jnp.maximum(x * bn0s.reshape(1, 1, 1, 1, C) + bn0b.reshape(1, 1, 1, 1, C), 0.0)
    h = lax.conv_general_dilated(h, w1, (1, 1, 1), [(p, p)] * 3,
                                 dimension_numbers=dn) + b1.reshape(C)
    h = jnp.maximum(h, 0.0)
    h = jnp.maximum(h * bn1s.reshape(1, 1, 1, 1, C) + bn1b.reshape(1, 1, 1, 1, C), 0.0)
    h = lax.conv_general_dilated(h, w2, (1, 1, 1), [(p, p)] * 3,
                                 dimension_numbers=dn) + b2.reshape(C)
    m = h.mean(axis=(1, 2, 3))                     # (N, C)
    gate = jax.nn.sigmoid(m @ ecaM)                # (N, C)
    return h * gate[:, None, None, None, :] + x


if __name__ == "__main__":
    # (N, D, H, W, C) -- PyTorch NCDHW equivalent is (2, 4, 8, 8, 8)
    N, D, H, W, C = 2, 8, 8, 8, 4
    k, p = 3, 1

    key = jax.random.PRNGKey(0)
    ks = jax.random.split(key, 16)

    x = jax.random.normal(ks[0], (N, D, H, W, C), jnp.float32)

    w1 = 0.1 * jax.random.normal(ks[1], (k, k, k, C, C), jnp.float32)
    b1 = 0.1 * jax.random.normal(ks[2], (C,), jnp.float32)
    w2 = 0.1 * jax.random.normal(ks[3], (k, k, k, C, C), jnp.float32)
    b2 = 0.1 * jax.random.normal(ks[4], (C,), jnp.float32)

    def bn_fold(kg, kb, km, kv, c, eps=1e-5):
        gamma = 1.0 + 0.1 * jax.random.normal(kg, (c,), jnp.float32)
        beta = 0.1 * jax.random.normal(kb, (c,), jnp.float32)
        mean = 0.1 * jax.random.normal(km, (c,), jnp.float32)
        var = 1.0 + 0.1 * jnp.abs(jax.random.normal(kv, (c,), jnp.float32))
        s = gamma / jnp.sqrt(var + eps)
        t = beta - mean * s
        return s, t

    bn0s, bn0b = bn_fold(ks[5], ks[6], ks[7], ks[8], C)
    bn1s, bn1b = bn_fold(ks[9], ks[10], ks[11], ks[12], C)

    # ECA: Conv2d(1, 1, 3, padding=1, bias=False) applied to a (b, 1, 1, C) map.
    # Only the middle row of the 3x3 kernel touches non-padded data, so it
    # reduces to a 3-tap 1D conv over channels; fold into a CxC band matrix.
    eca_w2d = 0.5 * jax.random.normal(ks[13], (3, 3), jnp.float32)
    taps = eca_w2d[1]
    ecaM = (taps[0] * jnp.eye(C, k=1)
            + taps[1] * jnp.eye(C)
            + taps[2] * jnp.eye(C, k=-1)).astype(jnp.float32)

    raw_params = (w1, b1, w2, b2, bn0s, bn0b, bn1s, bn1b, ecaM)
    kparams = prepare_kernel_params(raw_params, D, H, W, C, p)

    out = residual_forward(x, kparams)
    out = jax.block_until_ready(out)

    ref = residual_reference(x, raw_params, p=p)
    np.testing.assert_allclose(np.asarray(out), np.asarray(ref), rtol=2e-3, atol=2e-3)

    print("KERNEL_OK")
</pallas_src>

<mosaic_0001>
module attributes {stable_mosaic.version = 11 : i64} {
  func.func @_residual_kernel(%arg0: i32, %arg1: memref<1x8x256xf32, #tpu.memory_space<vmem>>, %arg2: memref<3x256x256xf32, #tpu.memory_space<vmem>>, %arg3: memref<1x256xf32, #tpu.memory_space<vmem>>, %arg4: memref<3x256x256xf32, #tpu.memory_space<vmem>>, %arg5: memref<1x256xf32, #tpu.memory_space<vmem>>, %arg6: memref<1x256xf32, #tpu.memory_space<vmem>>, %arg7: memref<1x256xf32, #tpu.memory_space<vmem>>, %arg8: memref<1x256xf32, #tpu.memory_space<vmem>>, %arg9: memref<1x256xf32, #tpu.memory_space<vmem>>, %arg10: memref<256x256xf32, #tpu.memory_space<vmem>>, %arg11: memref<1x8x256xf32, #tpu.memory_space<vmem>>, %arg12: memref<10x256xf32, #tpu.memory_space<vmem>>) attributes {dimension_semantics = [#tpu.dimension_semantics<parallel>], iteration_bounds = array<i64: 2>, scalar_prefetch = 0 : i64, scratch_operands = 1 : i64, tpu.core_type = #tpu.core_type<tc>, window_params = [{transform_indices = @transform_0, window_bounds = array<i64: 1, 8, 256>}, {pipeline_mode = #tpu.pipeline_mode<synchronous>, transform_indices = @transform_1, window_bounds = array<i64: 3, 256, 256>}, {pipeline_mode = #tpu.pipeline_mode<synchronous>, transform_indices = @transform_2, window_bounds = array<i64: 1, 256>}, {pipeline_mode = #tpu.pipeline_mode<synchronous>, transform_indices = @transform_3, window_bounds = array<i64: 3, 256, 256>}, {pipeline_mode = #tpu.pipeline_mode<synchronous>, transform_indices = @transform_4, window_bounds = array<i64: 1, 256>}, {pipeline_mode = #tpu.pipeline_mode<synchronous>, transform_indices = @transform_5, window_bounds = array<i64: 1, 256>}, {pipeline_mode = #tpu.pipeline_mode<synchronous>, transform_indices = @transform_6, window_bounds = array<i64: 1, 256>}, {pipeline_mode = #tpu.pipeline_mode<synchronous>, transform_indices = @transform_7, window_bounds = array<i64: 1, 256>}, {pipeline_mode = #tpu.pipeline_mode<synchronous>, transform_indices = @transform_8, window_bounds = array<i64: 1, 256>}, {pipeline_mode = #tpu.pipeline_mode<synchronous>, transform_indices = @transform_9, window_bounds = array<i64: 256, 256>}, {transform_indices = @transform_10, window_bounds = array<i64: 1, 8, 256>}]} {
    %c0 = arith.constant 0 : index
    %c0_0 = arith.constant 0 : index
    %c0_1 = arith.constant 0 : index
    %0 = vector.load %arg1[%c0, %c0_0, %c0_1] : memref<1x8x256xf32, #tpu.memory_space<vmem>>, vector<1x8x256xf32>
    %1 = vector.shape_cast %0 : vector<1x8x256xf32> to vector<8x256xf32>
    %c0_2 = arith.constant 0 : index
    %c0_3 = arith.constant 0 : index
    %2 = vector.load %arg6[%c0_2, %c0_3] : memref<1x256xf32, #tpu.memory_space<vmem>>, vector<1x256xf32>
    %3 = vector.broadcast %2 : vector<1x256xf32> to vector<8x256xf32>
    %4 = arith.mulf %1, %3 : vector<8x256xf32>
    %c0_4 = arith.constant 0 : index
    %c0_5 = arith.constant 0 : index
    %5 = vector.load %arg7[%c0_4, %c0_5] : memref<1x256xf32, #tpu.memory_space<vmem>>, vector<1x256xf32>
    %6 = vector.broadcast %5 : vector<1x256xf32> to vector<8x256xf32>
    %7 = arith.addf %4, %6 : vector<8x256xf32>
    %cst = arith.constant 0.000000e+00 : f32
    %8 = vector.broadcast %cst : f32 to vector<8x256xf32>
    %9 = arith.maximumf %7, %8 : vector<8x256xf32>
    %cst_6 = arith.constant 0.000000e+00 : f32
    %10 = vector.broadcast %cst_6 : f32 to vector<1x256xf32>
    %c0_7 = arith.constant 0 : index
    %c0_8 = arith.constant 0 : index
    %11 = vector.load %arg12[%c0_7, %c0_8] : memref<10x256xf32, #tpu.memory_space<vmem>>, vector<1x256xf32>
    tpu.vector_store %arg12[%c0_7, %c0_8], %10 {strides = array<i32>} : memref<10x256xf32, #tpu.memory_space<vmem>>, vector<1x256xf32>,
    %c9 = arith.constant 9 : index
    %c0_9 = arith.constant 0 : index
    %12 = vector.load %arg12[%c9, %c0_9] : memref<10x256xf32, #tpu.memory_space<vmem>>, vector<1x256xf32>
    tpu.vector_store %arg12[%c9, %c0_9], %10 {strides = array<i32>} : memref<10x256xf32, #tpu.memory_space<vmem>>, vector<1x256xf32>,
    %c1 = arith.constant 1 : index
    %c0_10 = arith.constant 0 : index
    %13 = vector.load %arg12[%c1, %c0_10] : memref<10x256xf32, #tpu.memory_space<vmem>>, vector<8x256xf32>
    tpu.vector_store %arg12[%c1, %c0_10], %9 {strides = array<i32>} : memref<10x256xf32, #tpu.memory_space<vmem>>, vector<8x256xf32>,
    %cst_11 = arith.constant 0.000000e+00 : f32
    %14 = vector.broadcast %cst_11 : f32 to vector<8x256xf32>
    %c0_12 = arith.constant 0 : index
    %c0_13 = arith.constant 0 : index
    %15 = vector.load %arg12[%c0_12, %c0_13] : memref<10x256xf32, #tpu.memory_space<vmem>>, vector<8x256xf32>
    %c0_14 = arith.constant 0 : index
    %c0_15 = arith.constant 0 : index
    %c0_16 = arith.constant 0 : index
    %16 = vector.load %arg2[%c0_14, %c0_15, %c0_16] : memref<3x256x256xf32, #tpu.memory_space<vmem>>, vector<1x256x256xf32>
    %17 = vector.shape_cast %16 : vector<1x256x256xf32> to vector<256x256xf32>
    %cst_17 = arith.constant dense<0.000000e+00> : vector<8x256xf32>
    %18 = tpu.matmul %15, %17, %cst_17 {dimension_numbers = #tpu.dot_dimension_numbers<[1], [0], [0], [1], [0, 0, 1, 1], [], []>} : vector<8x256xf32>, vector<256x256xf32>, vector<8x256xf32> -> vector<8x256xf32>
    %19 = arith.addf %14, %18 : vector<8x256xf32>
    %c1_18 = arith.constant 1 : index
    %c0_19 = arith.constant 0 : index
    %20 = vector.load %arg12[%c1_18, %c0_19] : memref<10x256xf32, #tpu.memory_space<vmem>>, vector<8x256xf32>
    %c1_20 = arith.constant 1 : index
    %c0_21 = arith.constant 0 : index
    %c0_22 = arith.constant 0 : index
    %21 = vector.load %arg2[%c1_20, %c0_21, %c0_22] : memref<3x256x256xf32, #tpu.memory_space<vmem>>, vector<1x256x256xf32>
    %22 = vector.shape_cast %21 : vector<1x256x256xf32> to vector<256x256xf32>
    %cst_23 = arith.constant dense<0.000000e+00> : vector<8x256xf32>
    %23 = tpu.matmul %20, %22, %cst_23 {dimension_numbers = #tpu.dot_dimension_numbers<[1], [0], [0], [1], [0, 0, 1, 1], [], []>} : vector<8x256xf32>, vector<256x256xf32>, vector<8x256xf32> -> vector<8x256xf32>
    %24 = arith.addf %19, %23 : vector<8x256xf32>
    %c2 = arith.constant 2 : index
    %c0_24 = arith.constant 0 : index
    %25 = vector.load %arg12[%c2, %c0_24] : memref<10x256xf32, #tpu.memory_space<vmem>>, vector<8x256xf32>
    %c2_25 = arith.constant 2 : index
    %c0_26 = arith.constant 0 : index
    %c0_27 = arith.constant 0 : index
    %26 = vector.load %arg2[%c2_25, %c0_26, %c0_27] : memref<3x256x256xf32, #tpu.memory_space<vmem>>, vector<1x256x256xf32>
    %27 = vector.shape_cast %26 : vector<1x256x256xf32> to vector<256x256xf32>
    %cst_28 = arith.constant dense<0.000000e+00> : vector<8x256xf32>
    %28 = tpu.matmul %25, %27, %cst_28 {dimension_numbers = #tpu.dot_dimension_numbers<[1], [0], [0], [1], [0, 0, 1, 1], [], []>} : vector<8x256xf32>, vector<256x256xf32>, vector<8x256xf32> -> vector<8x256xf32>
    %29 = arith.addf %24, %28 : vector<8x256xf32>
    %c0_29 = arith.constant 0 : index
    %c0_30 = arith.constant 0 : index
    %30 = vector.load %arg3[%c0_29, %c0_30] : memref<1x256xf32, #tpu.memory_space<vmem>>, vector<1x256xf32>
    %31 = vector.broadcast %30 : vector<1x256xf32> to vector<8x256xf32>
    %32 = arith.addf %29, %31 : vector<8x256xf32>
    %cst_31 = arith.constant 0.000000e+00 : f32
    %33 = vector.broadcast %cst_31 : f32 to vector<8x256xf32>
    %34 = arith.maximumf %32, %33 : vector<8x256xf32>
    %c0_32 = arith.constant 0 : index
    %c0_33 = arith.constant 0 : index
    %35 = vector.load %arg8[%c0_32, %c0_33] : memref<1x256xf32, #tpu.memory_space<vmem>>, vector<1x256xf32>
    %36 = vector.broadcast %35 : vector<1x256xf32> to vector<8x256xf32>
    %37 = arith.mulf %34, %36 : vector<8x256xf32>
    %c0_34 = arith.constant 0 : index
    %c0_35 = arith.constant 0 : index
    %38 = vector.load %arg9[%c0_34, %c0_35] : memref<1x256xf32, #tpu.memory_space<vmem>>, vector<1x256xf32>
    %39 = vector.broadcast %38 : vector<1x256xf32> to vector<8x256xf32>
    %40 = arith.addf %37, %39 : vector<8x256xf32>
    %cst_36 = arith.constant 0.000000e+00 : f32
    %41 = vector.broadcast %cst_36 : f32 to vector<8x256xf32>
    %42 = arith.maximumf %40, %41 : vector<8x256xf32>
    %c1_37 = arith.constant 1 : index
    %c0_38 = arith.constant 0 : index
    %43 = vector.load %arg12[%c1_37, %c0_38] : memref<10x256xf32, #tpu.memory_space<vmem>>, vector<8x256xf32>
    tpu.vector_store %arg12[%c1_37, %c0_38], %42 {strides = array<i32>} : memref<10x256xf32, #tpu.memory_space<vmem>>, vector<8x256xf32>,
    %cst_39 = arith.constant 0.000000e+00 : f32
    %44 = vector.broadcast %cst_39 : f32 to vector<8x256xf32>
    %c0_40 = arith.constant 0 : index
    %c0_41 = arith.constant 0 : index
    %45 = vector.load %arg12[%c0_40, %c0_41] : memref<10x256xf32, #tpu.memory_space<vmem>>, vector<8x256xf32>
    %c0_42 = arith.constant 0 : index
    %c0_43 = arith.constant 0 : index
    %c0_44 = arith.constant 0 : index
    %46 = vector.load %arg4[%c0_42, %c0_43, %c0_44] : memref<3x256x256xf32, #tpu.memory_space<vmem>>, vector<1x256x256xf32>
    %47 = vector.shape_cast %46 : vector<1x256x256xf32> to vector<256x256xf32>
    %cst_45 = arith.constant dense<0.000000e+00> : vector<8x256xf32>
    %48 = tpu.matmul %45, %47, %cst_45 {dimension_numbers = #tpu.dot_dimension_numbers<[1], [0], [0], [1], [0, 0, 1, 1], [], []>} : vector<8x256xf32>, vector<256x256xf32>, vector<8x256xf32> -> vector<8x256xf32>
    %49 = arith.addf %44, %48 : vector<8x256xf32>
    %c1_46 = arith.constant 1 : index
    %c0_47 = arith.constant 0 : index
    %50 = vector.load %arg12[%c1_46, %c0_47] : memref<10x256xf32, #tpu.memory_space<vmem>>, vector<8x256xf32>
    %c1_48 = arith.constant 1 : index
    %c0_49 = arith.constant 0 : index
    %c0_50 = arith.constant 0 : index
    %51 = vector.load %arg4[%c1_48, %c0_49, %c0_50] : memref<3x256x256xf32, #tpu.memory_space<vmem>>, vector<1x256x256xf32>
    %52 = vector.shape_cast %51 : vector<1x256x256xf32> to vector<256x256xf32>
    %cst_51 = arith.constant dense<0.000000e+00> : vector<8x256xf32>
    %53 = tpu.matmul %50, %52, %cst_51 {dimension_numbers = #tpu.dot_dimension_numbers<[1], [0], [0], [1], [0, 0, 1, 1], [], []>} : vector<8x256xf32>, vector<256x256xf32>, vector<8x256xf32> -> vector<8x256xf32>
    %54 = arith.addf %49, %53 : vector<8x256xf32>
    %c2_52 = arith.constant 2 : index
    %c0_53 = arith.constant 0 : index
    %55 = vector.load %arg12[%c2_52, %c0_53] : memref<10x256xf32, #tpu.memory_space<vmem>>, vector<8x256xf32>
    %c2_54 = arith.constant 2 : index
    %c0_55 = arith.constant 0 : index
    %c0_56 = arith.constant 0 : index
    %56 = vector.load %arg4[%c2_54, %c0_55, %c0_56] : memref<3x256x256xf32, #tpu.memory_space<vmem>>, vector<1x256x256xf32>
    %57 = vector.shape_cast %56 : vector<1x256x256xf32> to vector<256x256xf32>
    %cst_57 = arith.constant dense<0.000000e+00> : vector<8x256xf32>
    %58 = tpu.matmul %55, %57, %cst_57 {dimension_numbers = #tpu.dot_dimension_numbers<[1], [0], [0], [1], [0, 0, 1, 1], [], []>} : vector<8x256xf32>, vector<256x256xf32>, vector<8x256xf32> -> vector<8x256xf32>
    %59 = arith.addf %54, %58 : vector<8x256xf32>
    %c0_58 = arith.constant 0 : index
    %c0_59 = arith.constant 0 : index
    %60 = vector.load %arg5[%c0_58, %c0_59] : memref<1x256xf32, #tpu.memory_space<vmem>>, vector<1x256xf32>
    %61 = vector.broadcast %60 : vector<1x256xf32> to vector<8x256xf32>
    %62 = arith.addf %59, %61 : vector<8x256xf32>
    %cst_60 = arith.constant dense<0.000000e+00> : vector<256xf32>
    %63 = vector.multi_reduction <add>, %62, %cst_60 [0] : vector<8x256xf32> to vector<256xf32>
    %64 = vector.shape_cast %63 : vector<256xf32> to vector<1x256xf32>
    %c0_61 = arith.constant 0 : index
    %c0_62 = arith.constant 0 : index
    %65 = vector.load %arg10[%c0_61, %c0_62] : memref<256x256xf32, #tpu.memory_space<vmem>>, vector<256x256xf32>
    %cst_63 = arith.constant dense<0.000000e+00> : vector<1x256xf32>
    %66 = tpu.matmul %64, %65, %cst_63 {dimension_numbers = #tpu.dot_dimension_numbers<[1], [0], [0], [1], [0, 0, 1, 1], [], []>} : vector<1x256xf32>, vector<256x256xf32>, vector<1x256xf32> -> vector<1x256xf32>
    %67 = arith.negf %66 : vector<1x256xf32>
    %68 = math.exp %67 : vector<1x256xf32>
    %cst_64 = arith.constant 1.000000e+00 : f32
    %69 = vector.broadcast %cst_64 : f32 to vector<1x256xf32>
    %70 = arith.addf %69, %68 : vector<1x256xf32>
    %71 = arith.divf %69, %70 : vector<1x256xf32>
    %72 = vector.broadcast %71 : vector<1x256xf32> to vector<8x256xf32>
    %73 = arith.mulf %62, %72 : vector<8x256xf32>
    %74 = arith.addf %73, %1 : vector<8x256xf32>
    %c0_65 = arith.constant 0 : index
    %c0_66 = arith.constant 0 : index
    %c0_67 = arith.constant 0 : index
    %75 = vector.load %arg11[%c0_65, %c0_66, %c0_67] : memref<1x8x256xf32, #tpu.memory_space<vmem>>, vector<1x8x256xf32>
    %76 = vector.shape_cast %75 : vector<1x8x256xf32> to vector<8x256xf32>
    %77 = vector.shape_cast %74 : vector<8x256xf32> to vector<1x8x256xf32>
    tpu.vector_store %arg11[%c0_65, %c0_66, %c0_67], %77 {strides = array<i32>} : memref<1x8x256xf32, #tpu.memory_space<vmem>>, vector<1x8x256xf32>,
    return
  }
  func.func @transform_0(%arg0: i32) -> (i32, i32, i32) {
    %c0_i32 = arith.constant 0 : i32
    %c0_i32_0 = arith.constant 0 : i32
    %c0_i32_1 = arith.constant 0 : i32
    return %arg0, %c0_i32, %c0_i32_0 : i32, i32, i32
  }
  func.func @transform_1(%arg0: i32) -> (i32, i32, i32) {
    %c0_i32 = arith.constant 0 : i32
    %c0_i32_0 = arith.constant 0 : i32
    %c0_i32_1 = arith.constant 0 : i32
    %c0_i32_2 = arith.constant 0 : i32
    return %c0_i32, %c0_i32_0, %c0_i32_1 : i32, i32, i32
  }
  func.func @transform_2(%arg0: i32) -> (i32, i32) {
    %c0_i32 = arith.constant 0 : i32
    %c0_i32_0 = arith.constant 0 : i32
    %c0_i32_1 = arith.constant 0 : i32
    return %c0_i32, %c0_i32_0 : i32, i32
  }
  func.func @transform_3(%arg0: i32) -> (i32, i32, i32) {
    %c0_i32 = arith.constant 0 : i32
    %c0_i32_0 = arith.constant 0 : i32
    %c0_i32_1 = arith.constant 0 : i32
    %c0_i32_2 = arith.constant 0 : i32
    return %c0_i32, %c0_i32_0, %c0_i32_1 : i32, i32, i32
  }
  func.func @transform_4(%arg0: i32) -> (i32, i32) {
    %c0_i32 = arith.constant 0 : i32
    %c0_i32_0 = arith.constant 0 : i32
    %c0_i32_1 = arith.constant 0 : i32
    return %c0_i32, %c0_i32_0 : i32, i32
  }
  func.func @transform_5(%arg0: i32) -> (i32, i32) {
    %c0_i32 = arith.constant 0 : i32
    %c0_i32_0 = arith.constant 0 : i32
    %c0_i32_1 = arith.constant 0 : i32
    return %c0_i32, %c0_i32_0 : i32, i32
  }
  func.func @transform_6(%arg0: i32) -> (i32, i32) {
    %c0_i32 = arith.constant 0 : i32
    %c0_i32_0 = arith.constant 0 : i32
    %c0_i32_1 = arith.constant 0 : i32
    return %c0_i32, %c0_i32_0 : i32, i32
  }
  func.func @transform_7(%arg0: i32) -> (i32, i32) {
    %c0_i32 = arith.constant 0 : i32
    %c0_i32_0 = arith.constant 0 : i32
    %c0_i32_1 = arith.constant 0 : i32
    return %c0_i32, %c0_i32_0 : i32, i32
  }
  func.func @transform_8(%arg0: i32) -> (i32, i32) {
    %c0_i32 = arith.constant 0 : i32
    %c0_i32_0 = arith.constant 0 : i32
    %c0_i32_1 = arith.constant 0 : i32
    return %c0_i32, %c0_i32_0 : i32, i32
  }
  func.func @transform_9(%arg0: i32) -> (i32, i32) {
    %c0_i32 = arith.constant 0 : i32
    %c0_i32_0 = arith.constant 0 : i32
    %c0_i32_1 = arith.constant 0 : i32
    return %c0_i32, %c0_i32_0 : i32, i32
  }
  func.func @transform_10(%arg0: i32) -> (i32, i32, i32) {
    %c0_i32 = arith.constant 0 : i32
    %c0_i32_0 = arith.constant 0 : i32
    %c0_i32_1 = arith.constant 0 : i32
    return %arg0, %c0_i32, %c0_i32_0 : i32, i32, i32
  }
}

</mosaic_0001>

<bundles_post_ra>
// kernel: tpu_custom_call.1
= control target key start
LH: loop header
LB: loop body
LE: loop exit
PB: predicated region body
PF: predicated region fallthrough
CT: control target
= control target key end

     0   :  { %s2575_s0 = inlined_call_operand.hbm [shape: f32[2,8,256], index: 0, kind: input, shape index: {}]   ;;  %s2576_s1 = inlined_call_operand.hbm [shape: f32[3,256,256], index: 1, kind: input, shape index: {}]   ;;  %s2577_s2 = inlined_call_operand.hbm [shape: f32[1,256], index: 2, kind: input, shape index: {}]   ;;  %s2578_s3 = inlined_call_operand.hbm [shape: f32[3,256,256], index: 3, kind: input, shape index: {}]   ;;  %s2579_s4 = inlined_call_operand.vmem [shape: f32[1,256], index: 4, kind: input, shape index: {}]   ;;  %s2580_s5 = inlined_call_operand.vmem [shape: f32[1,256], index: 5, kind: input, shape index: {}]   ;;  %s2581_s6 = inlined_call_operand.hbm [shape: f32[1,256], index: 6, kind: input, shape index: {}]   ;;  %s2582_s7 = inlined_call_operand.vmem [shape: f32[1,256], index: 7, kind: input, shape index: {}]   ;;  %s2583_s8 = inlined_call_operand.hbm [shape: f32[1,256], index: 8, kind: input, shape index: {}]   ;;  %s2584_s9 = inlined_call_operand.hbm [shape: f32[256,256], index: 9, kind: input, shape index: {}]   ;;  %s2585_s10 = inlined_call_operand.hbm [shape: f32[2,8,256], index: 10, kind: output, shape index: {}]  }
   0x1   :  { %2586 = sst [smem:[#allocation21_spill]] %s2576_s1 }
   0x2   :  { %2587 = sst [smem:[#allocation22_spill]] %s2577_s2 }
   0x3   :  { %2588 = sst [smem:[#allocation23_spill]] %s2578_s3 }
   0x4   :  { %2589 = sst [smem:[#allocation24_spill]] %s2581_s6 }
   0x5   :  { %2590 = sst [smem:[#allocation25_spill]] %s2583_s8 }
   0x6   :  { %15 = vsyncpa [#allocation4], 0 }
   0x7   :  { %17 = vsyncpa [#allocation4 + $0x1], 0 }
   0x8   :  { %18 = vsyncpa [#allocation7], 0 }
   0x9   :  { %19 = vsyncpa [#allocation10], 0 }
   0xa   :  { %20 = vsyncpa [#allocation13], 0 }
   0xb   :  { %21 = vsyncpa [#allocation5], 0 }
   0xc   :  { %23 = vsyncpa [#allocation5 + $0x1], 0  ;;  %s2348_s13 = smov 0   ;;  %s2350_s14 = smov 0  }
   0xd   :  { %s2352_s15 = smov 0   ;;  %s2354_s16 = smov 0  }
   0xe LB: > { %s2591_s1 = sld [smem:[#allocation21_spill]]  ;;  %s2372_s20 = sadd.s32 4294967295, %s2282_s16   ;;  %s2282_s16 = sphi %s2354_s16, %s2607_s16   ;;  %s2278_s15 = sphi %s2352_s15, %s2606_s15   ;;  %s2274_s14 = sphi %s2350_s14, %s2605_s14   ;;  %s2270_s13 = sphi %s2348_s13, %s2604_s13  }
   0xf   : > { %p1845_p0 = scmp.ge.s32.totalorder %s2282_s16, 1  ;;  %p50_p1 = scmp.eq.s32.totalorder %s2372_s20, 0 }
  0x10   : > { %p275_p2 = scmp.lt.s32.totalorder %s2282_s16, 3  ;;  %s2284_s22 = smov [#allocation6]  }
  0x11   : > { %s288_s23 = sshll.u32 %s2284_s22, 4  ;;  %s2593_s3 = sld [smem:[#allocation23_spill]]  ;;  %s289_s23 = int_to_ptr.vmem [resolvable:$true] %s288_s23 }
  0x12   : > { %p2377_p3 = pnand %p1845_p0, %p275_p2  ;;  %s2595_s8 = sld [smem:[#allocation25_spill]] }
  0x13   : > { %s2285_s11 = smov [#allocation9]   ;;  %s2286_s17 = smov 256  }
  0x14   : > { %s286_s19 = sshll.u32 %s2591_s1, 4  ;;  %p1902_p4 = pneg %p2377_p3  ;;  %s287_s19 = int_to_ptr.hbm [resolvable:$true] %s286_s19 }
  0x15   : > { %s314_s12 = sshll.u32 %s2285_s11, 4  ;;  %s2287_s18 = smov 16   ;;  %s315_s12 = int_to_ptr.vmem [resolvable:$true] %s314_s12 }
  0x16   : > { %p2389_p6 = pnand %p1902_p4, %p50_p1  ;;  %s2596_s2 = sld [smem:[#allocation22_spill]] }
  0x17   : > { %s312_s26 = sshll.u32 %s2593_s3, 4  ;;  %s2288_s28 = smov [#allocation12]   ;;  %s313_s26 = int_to_ptr.hbm [resolvable:$true] %s312_s26 }
  0x18   : > { %s348_s30 = sshll.u32 %s2595_s8, 4  ;;  %s350_s29 = sshll.u32 %s2288_s28, 4  ;;  %s349_s30 = int_to_ptr.hbm [resolvable:$true] %s348_s30  ;;  %s351_s29 = int_to_ptr.vmem [resolvable:$true] %s350_s29 }
  0x19   : > { %1905 = dma.hbm_to_vmem [thread:$0]  (!%p2389_p6), %s287_s19, 24576, %s289_s23, [#allocation7], %s2286_s17, %s2286_s17, %s2287_s18  }
  0x1a   : > { %1911 = dma.hbm_to_vmem [thread:$0]  (!%p2389_p6), %s313_s26, 24576, %s315_s12, [#allocation10], %s2286_s17, %s2286_s17, %s2287_s18  }
  0x1b   : > { %1917 = dma.hbm_to_vmem [thread:$0]  (!%p2389_p6), %s349_s30, 32, %s351_s29, [#allocation13]  }
  0x1c   : > { %s301_s25 = sshll.u32 %s2596_s2, 4  ;;  %s2289_s19 = smov [#allocation8]   ;;  %s302_s25 = int_to_ptr.hbm [resolvable:$true] %s301_s25 }
  0x1d   : > { %s303_s23 = sshll.u32 %s2289_s19, 4  ;;  %s2597_s6 = sld [smem:[#allocation24_spill]]  ;;  %s304_s23 = int_to_ptr.vmem [resolvable:$true] %s303_s23 }
  0x1e   : > { %1908 = dma.hbm_to_vmem [thread:$0]  (!%p2389_p6), %s302_s25, 32, %s304_s23, [#allocation7]  }
  0x1f   : > { %s359_s30 = sshll.u32 %s2584_s9, 4  ;;  %s2290_s24 = smov [#allocation11]   ;;  %s360_s30 = int_to_ptr.hbm [resolvable:$true] %s359_s30 }
  0x20   : > { %s335_s28 = sshll.u32 %s2290_s24, 4  ;;  %s2291_s1 = smov [#allocation14]   ;;  %s336_s28 = int_to_ptr.vmem [resolvable:$true] %s335_s28 }
  0x21   : > { %s361_s25 = sshll.u32 %s2291_s1, 4  ;;  %s1844_s29 = sadd.s32 4294967294, %s2282_s16   ;;  %s362_s25 = int_to_ptr.vmem [resolvable:$true] %s361_s25 }
  0x22   : > { %1920 = dma.hbm_to_vmem [thread:$0]  (!%p2389_p6), %s360_s30, 8192, %s362_s25, [#allocation13], %s2286_s17, %s2286_s17, %s2287_s18  }
  0x23   : > { %s333_s26 = sshll.u32 %s2597_s6, 4  ;;  %s2428_s19 = sadd.s32 1, %s2282_s16   ;;  %s334_s26 = int_to_ptr.hbm [resolvable:$true] %s333_s26 }
  0x24   : > { %1914 = dma.hbm_to_vmem [thread:$0]  (!%p2389_p6), %s334_s26, 32, %s336_s28, [#allocation10]  }
  0x25   : > { %s33_s23 = ssub.s32 %s2282_s16, %s2428_s19  ;;  %s36_s11 = sadd.s32 1, %s2278_s15 }
  0x26   : > { %p34_p7 = scmp.eq.s32.totalorder %s33_s23, 0  ;;  %p43_p8 = scmp.ne.s32.totalorder %s2278_s15, %s2274_s14 }
  0x27   : > { %p44_p9 = scmp.eq.s32.totalorder %s2282_s16, 0  ;;  %p49_p10 = scmp.ne.s32.totalorder %s2274_s14, %s2270_s13 }
  0x28   : > { %s2439_s26 = scalar_select %p34_p7, %s2278_s15, %s36_s11  }
  0x29   : > { %p2441_p11 = por %p44_p9, %p43_p8  ;;  %p2447_p12 = por %p50_p1, %p49_p10 }
  0x2a   : > { %p262_p13 = scmp.eq.s32.totalorder %s2372_s20, 1  ;;  %p268_p0 = scmp.eq.s32.totalorder %s1844_s29, 1 }
  0x2b   : > { %p1935_p2 = scmp.lt.s32.totalorder %s2282_s16, 2  ;;  %s375_s18 = sand.u32 1, %s2278_s15  }
  0x2c   : > { %p2454_p4 = por %p262_p13, %p43_p8  ;;  %p2458_p6 = por %p268_p0, %p49_p10 }
  0x2d   : > { %s1853_s30 = sshll.u32 %s375_s18, 4  ;;  %s1872_s24 = sshll.u32 %s2282_s16, 4 }
  0x2e   : > { %s384_s25 = scalar_lea.hbm %s2575_s0, %s1872_s24  ;;  %s379_s23 = scalar_lea.vmem [#allocation3], %s1853_s30 }
  0x2f   : > { %s388_s11 = sshll.u32 %s379_s23, 4  ;;  %s386_s2 = sshll.u32 %s384_s25, 4  ;;  %s389_s11 = int_to_ptr.vmem [resolvable:$true] %s388_s11  ;;  %s387_s2 = int_to_ptr.hbm [resolvable:$true] %s386_s2 }
  0x30   : > { %p2468_p7 = pnand %p1935_p2, %p2441_p11  ;;  %s376_s3 = scalar_lea.sflag [#allocation4], %s375_s18 }
  0x31   : > { %s2174_s6 = sshra.s32 %s387_s2, 4  ;;  %s2181_s28 = scalar_lea.hbm %s2575_s0, 32  ;;  %s2175_s6 = int_to_ptr.hbm [resolvable:$true] %s2174_s6 }
  0x32   : > { %s2176_s8 = scalar_lea.hbm %s2175_s6, 16  ;;  %p2178_p9 = pneg %p2468_p7 }
  0x33   : > { %p2177_p8 = scmp.ne.s32.totalorder %s2175_s6, %s2176_s8  ;;  %p2182_p11 = scmp.lt.s32.totalorder %s2175_s6, %s2575_s0 }
  0x34   : > { %p2183_p0 = scmp.lt.s32.totalorder %s2181_s28, %s2176_s8 }
  0x35   : > { %p2179_p10 = pnand %p2178_p9, %p2177_p8 }
  0x36   : > { %p2184_p2 = por %p2183_p0, %p2182_p11 }
  0x37   : > { %p2180_p13 = pneg %p2179_p10 }
  0x39   : > { %p2185_p5 = pnand %p2184_p2, %p2180_p13 }
  0x3b   : > { %2188 = shalt.err (!%p2185_p5)
}
  0x3c   : > { %1924 = dma.hbm_to_vmem [thread:$0]  (!%p2468_p7), %s387_s2, 256, %s389_s11, %s376_s3  }
  0x3d   : > { %397 = sbr.rel (%p2377_p3) target bundleno = 691 (0x2b3), region = 60  ;;  %s2485_s18 = sand.u32 (!%p2377_p3), 1, %s2274_s14  }
  0x3e   : > { %s1857_s25 = sshll.u32 (!%p2377_p3), %s2485_s18, 4  ;;  %s400_s23 = scalar_lea.sflag (!%p2377_p3), [#allocation4], %s2485_s18 }
  0x3f   : > { %s2491_s6 = scalar_lea.vmem (!%p2377_p3), [#allocation3], %s1857_s25 }
  0x42   : > { %2249 = dma.done.wait (%p2447_p12), %s400_s23, 256  }
  0x43   : > { %2251 = vsyncadd (%p2447_p12), %s400_s23, 4294967040 }
  0x44   : > { %2253 = dma.done.wait (%p50_p1), [#allocation7], 24608  }
  0x45   : > { %2255 = vsyncadd (%p50_p1), [#allocation7], 4294942688 }
  0x46   : > { %2257 = dma.done.wait (%p50_p1), [#allocation10], 24608  }
  0x47   : > { %2259 = vsyncadd (%p50_p1), [#allocation10], 4294942688 }
  0x48   : > { %2261 = dma.done.wait (%p50_p1), [#allocation13], 8224  }
  0x49   : > { %2263 = vsyncadd (%p50_p1), [#allocation13], 4294959072  ;;  %v611_v0 = vld [vmem:[#allocation6 + $0x2f0] sm:$0xff]  ;;  %v612_v2 = vld [vmem:[#allocation6 + $0x2f8] sm:$0xff]  ;;  %v491_v60 = vlaneseq  ;;  %vm649_vm1 = vcmask 1046528   ;;  %vm891_vm2 = vcmask 1045504  }
  0x4a   : > { %v643_v1 = vld [vmem:[#allocation6 + $0x3f0] sm:$0xff]  ;;  %658 = vmatpush.msra.mxu0 %v611_v0  ;;  %v644_v3 = vld [vmem:[#allocation6 + $0x3f8] sm:$0xff]  ;;  %v609_v4 = vld [vmem:[#allocation6 + $0x2e0] sm:$0xff]  ;;  %698 = vmatpush.msra.mxu2 %v612_v2  ;;  %s1873_s29 = sshll.u32 %s2372_s20, 4  ;;  %s470_s20 = scalar_lea.vmem [#allocation15], %s1857_s25 }
  0x4b   : > { %678 = vmatpush.msra.mxu1 %v643_v1  ;;  %v641_v5 = vld [vmem:[#allocation6 + $0x3e0] sm:$0xff]  ;;  %718 = vmatpush.msra.mxu3 %v644_v3  ;;  %v610_v6 = vld [vmem:[#allocation6 + $0x2e8] sm:$0xff]  ;;  %v607_v8 = vld [vmem:[#allocation6 + $0x2d0] sm:$0xff]  ;;  %vm493_vm0 = vcmp.lt.s32.totalorder %v491_v60, 256  ;;  %v2292_v3 = vmov 0.0   ;;  %s1712_s28 = scalar_lea.hbm %s2585_s10, %s1873_s29  ;;  %s1714_s1 = sshll.u32 %s470_s20, 4  ;;  %s1715_s1 = int_to_ptr.vmem [resolvable:$true] %s1714_s1 }
  0x4c   : > { %v642_v7 = vld [vmem:[#allocation6 + $0x3e8] sm:$0xff]  ;;  %659 = vmatpush.msra.mxu0 %v609_v4  ;;  %v639_v9 = vld [vmem:[#allocation6 + $0x3d0] sm:$0xff]  ;;  %v608_v10 = vld [vmem:[#allocation6 + $0x2d8] sm:$0xff]  ;;  %699 = vmatpush.msra.mxu2 %v610_v6  ;;  %495 = vst.msk [vmem:[#allocation2] ss:$8 sm:$0x3] %vm493_vm0, %v2292_v3 }
  0x4d   : > { %679 = vmatpush.msra.mxu1 %v641_v5  ;;  %v640_v11 = vld [vmem:[#allocation6 + $0x3d8] sm:$0xff]  ;;  %719 = vmatpush.msra.mxu3 %v642_v7  ;;  %v605_v12 = vld [vmem:[#allocation6 + $0x2c0] sm:$0xff]  ;;  %v606_v14 = vld [vmem:[#allocation6 + $0x2c8] sm:$0xff]  ;;  %498 = vst.msk [vmem:[#allocation2 + $0x11] ss:$8 sm:$0x3] %vm493_vm0, %v2292_v3 }
  0x4e   : > { %v637_v13 = vld [vmem:[#allocation6 + $0x3c0] sm:$0xff]  ;;  %660 = vmatpush.msra.mxu0 %v607_v8  ;;  %v638_v15 = vld [vmem:[#allocation6 + $0x3c8] sm:$0xff]  ;;  %700 = vmatpush.msra.mxu2 %v608_v10  ;;  %v603_v16 = vld [vmem:[#allocation6 + $0x2b0] sm:$0xff]  ;;  %s1716_s27 = sshll.u32 %s1712_s28, 4  ;;  %s1701_s23 = scalar_lea.sflag [#allocation5], %s2485_s18  ;;  %s1717_s27 = int_to_ptr.hbm [resolvable:$true] %s1716_s27 }
  0x4f   : > { %680 = vmatpush.msra.mxu1 %v639_v9  ;;  %720 = vmatpush.msra.mxu3 %v640_v11  ;;  %v635_v17 = vld [vmem:[#allocation6 + $0x3b0] sm:$0xff]  ;;  %v604_v18 = vld [vmem:[#allocation6 + $0x2b8] sm:$0xff]  ;;  %v601_v20 = vld [vmem:[#allocation6 + $0x2a0] sm:$0xff]  ;;  %s2218_s2 = sshra.s32 %s1717_s27, 4  ;;  %s2224_s21 = scalar_lea.hbm %s2585_s10, 32  ;;  %s2219_s2 = int_to_ptr.hbm [resolvable:$true] %s2218_s2 }
  0x50   : > { %661 = vmatpush.msra.mxu0 %v605_v12  ;;  %v636_v19 = vld [vmem:[#allocation6 + $0x3b8] sm:$0xff]  ;;  %701 = vmatpush.msra.mxu2 %v606_v14  ;;  %v633_v21 = vld [vmem:[#allocation6 + $0x3a0] sm:$0xff]  ;;  %v602_v22 = vld [vmem:[#allocation6 + $0x2a8] sm:$0xff]  ;;  %s2220_s3 = scalar_lea.hbm %s2219_s2, 16  ;;  %p2225_p12 = scmp.lt.s32.totalorder %s2219_s2, %s2585_s10 }
  0x51   : > { %681 = vmatpush.msra.mxu1 %v637_v13  ;;  %721 = vmatpush.msra.mxu3 %v638_v15  ;;  %v634_v23 = vld [vmem:[#allocation6 + $0x3a8] sm:$0xff]  ;;  %v599_v24 = vld [vmem:[#allocation6 + $0x290] sm:$0xff]  ;;  %v600_v26 = vld [vmem:[#allocation6 + $0x298] sm:$0xff]  ;;  %p2221_p1 = scmp.ne.s32.totalorder %s2219_s2, %s2220_s3  ;;  %p2226_p7 = scmp.lt.s32.totalorder %s2224_s21, %s2220_s3 }
  0x52   : > { %662 = vmatpush.msra.mxu0 %v603_v16  ;;  %702 = vmatpush.msra.mxu2 %v604_v18  ;;  %v631_v25 = vld [vmem:[#allocation6 + $0x390] sm:$0xff]  ;;  %v632_v27 = vld [vmem:[#allocation6 + $0x398] sm:$0xff]  ;;  %v597_v28 = vld [vmem:[#allocation6 + $0x280] sm:$0xff] }
  0x53   : > { %682 = vmatpush.msra.mxu1 %v635_v17  ;;  %722 = vmatpush.msra.mxu3 %v636_v19  ;;  %v629_v29 = vld [vmem:[#allocation6 + $0x380] sm:$0xff]  ;;  %v598_v30 = vld [vmem:[#allocation6 + $0x288] sm:$0xff]  ;;  %v595_v32 = vld [vmem:[#allocation6 + $0x270] sm:$0xff]  ;;  %p2222_p3 = pnand %p2221_p1, %p2454_p4  ;;  %p2227_p8 = por %p2226_p7, %p2225_p12 }
  0x54   : > { %663 = vmatpush.msra.mxu0 %v601_v20  ;;  %703 = vmatpush.msra.mxu2 %v602_v22  ;;  %v630_v31 = vld [vmem:[#allocation6 + $0x388] sm:$0xff]  ;;  %v627_v33 = vld [vmem:[#allocation6 + $0x370] sm:$0xff]  ;;  %v596_v34 = vld [vmem:[#allocation6 + $0x278] sm:$0xff] }
  0x55   : > { %683 = vmatpush.msra.mxu1 %v633_v21  ;;  %723 = vmatpush.msra.mxu3 %v634_v23  ;;  %v628_v35 = vld [vmem:[#allocation6 + $0x378] sm:$0xff]  ;;  %v593_v36 = vld [vmem:[#allocation6 + $0x260] sm:$0xff]  ;;  %v594_v38 = vld [vmem:[#allocation6 + $0x268] sm:$0xff]  ;;  %p2223_p5 = pneg %p2222_p3 }
  0x56   : > { %664 = vmatpush.msra.mxu0 %v599_v24  ;;  %704 = vmatpush.msra.mxu2 %v600_v26  ;;  %v625_v37 = vld [vmem:[#allocation6 + $0x360] sm:$0xff]  ;;  %v626_v39 = vld [vmem:[#allocation6 + $0x368] sm:$0xff]  ;;  %v591_v40 = vld [vmem:[#allocation6 + $0x250] sm:$0xff] }
  0x57   : > { %684 = vmatpush.msra.mxu1 %v631_v25  ;;  %724 = vmatpush.msra.mxu3 %v632_v27  ;;  %v623_v41 = vld [vmem:[#allocation6 + $0x350] sm:$0xff]  ;;  %v592_v42 = vld [vmem:[#allocation6 + $0x258] sm:$0xff]  ;;  %v589_v44 = vld [vmem:[#allocation6 + $0x240] sm:$0xff]  ;;  %p2228_p9 = pnand %p2227_p8, %p2223_p5 }
  0x58   : > { %665 = vmatpush.msra.mxu0 %v597_v28  ;;  %705 = vmatpush.msra.mxu2 %v598_v30  ;;  %v624_v43 = vld [vmem:[#allocation6 + $0x358] sm:$0xff]  ;;  %v621_v45 = vld [vmem:[#allocation6 + $0x340] sm:$0xff]  ;;  %v590_v46 = vld [vmem:[#allocation6 + $0x248] sm:$0xff] }
  0x59   : > { %685 = vmatpush.msra.mxu1 %v629_v29  ;;  %725 = vmatpush.msra.mxu3 %v630_v31  ;;  %v622_v47 = vld [vmem:[#allocation6 + $0x348] sm:$0xff]  ;;  %v587_v48 = vld [vmem:[#allocation6 + $0x230] sm:$0xff]  ;;  %v588_v50 = vld [vmem:[#allocation6 + $0x238] sm:$0xff] }
  0x5a   : > { %666 = vmatpush.msra.mxu0 %v595_v32  ;;  %706 = vmatpush.msra.mxu2 %v596_v34  ;;  %v619_v49 = vld [vmem:[#allocation6 + $0x330] sm:$0xff]  ;;  %v620_v51 = vld [vmem:[#allocation6 + $0x338] sm:$0xff]  ;;  %v585_v52 = vld [vmem:[#allocation6 + $0x220] sm:$0xff] }
  0x5b   : > { %686 = vmatpush.msra.mxu1 %v627_v33  ;;  %726 = vmatpush.msra.mxu3 %v628_v35  ;;  %v617_v53 = vld [vmem:[#allocation6 + $0x320] sm:$0xff]  ;;  %v586_v54 = vld [vmem:[#allocation6 + $0x228] sm:$0xff]  ;;  %v583_v56 = vld [vmem:[#allocation6 + $0x210] sm:$0xff] }
  0x5c   : > { %667 = vmatpush.msra.mxu0 %v593_v36  ;;  %707 = vmatpush.msra.mxu2 %v594_v38  ;;  %v618_v55 = vld [vmem:[#allocation6 + $0x328] sm:$0xff]  ;;  %v615_v57 = vld [vmem:[#allocation6 + $0x310] sm:$0xff]  ;;  %v584_v58 = vld [vmem:[#allocation6 + $0x218] sm:$0xff] }
  0x5d   : > { %687 = vmatpush.msra.mxu1 %v625_v37  ;;  %727 = vmatpush.msra.mxu3 %v626_v39  ;;  %v616_v59 = vld [vmem:[#allocation6 + $0x318] sm:$0xff]  ;;  %v581_v61 = vld [vmem:[#allocation6 + $0x200] sm:$0xff]  ;;  %v582_v63 = vld [vmem:[#allocation6 + $0x208] sm:$0xff] }
  0x5e   : > { %668 = vmatpush.msra.mxu0 %v591_v40  ;;  %708 = vmatpush.msra.mxu2 %v592_v42  ;;  %v613_v62 = vld [vmem:[#allocation6 + $0x300] sm:$0xff]  ;;  %v614_v0 = vld [vmem:[#allocation6 + $0x308] sm:$0xff]  ;;  %v542_v1 = vld [vmem:[#allocation6 + $0xf0] sm:$0xff] }
  0x5f   : > { %688 = vmatpush.msra.mxu1 %v623_v41  ;;  %728 = vmatpush.msra.mxu3 %v624_v43  ;;  %v574_v2 = vld [vmem:[#allocation6 + $0x1f0] sm:$0xff]  ;;  %v543_v4 = vld [vmem:[#allocation6 + $0xf8] sm:$0xff]  ;;  %v540_v6 = vld [vmem:[#allocation6 + $0xe0] sm:$0xff] }
  0x60   : > { %669 = vmatpush.msra.mxu0 %v589_v44  ;;  %709 = vmatpush.msra.mxu2 %v590_v46  ;;  %v575_v5 = vld [vmem:[#allocation6 + $0x1f8] sm:$0xff]  ;;  %v572_v7 = vld [vmem:[#allocation6 + $0x1e0] sm:$0xff]  ;;  %v541_v8 = vld [vmem:[#allocation6 + $0xe8] sm:$0xff] }
  0x61   : > { %689 = vmatpush.msra.mxu1 %v621_v45  ;;  %729 = vmatpush.msra.mxu3 %v622_v47  ;;  %v573_v9 = vld [vmem:[#allocation6 + $0x1e8] sm:$0xff]  ;;  %v538_v10 = vld [vmem:[#allocation6 + $0xd0] sm:$0xff]  ;;  %v539_v12 = vld [vmem:[#allocation6 + $0xd8] sm:$0xff] }
  0x62   : > { %670 = vmatpush.msra.mxu0 %v587_v48  ;;  %710 = vmatpush.msra.mxu2 %v588_v50  ;;  %v570_v11 = vld [vmem:[#allocation6 + $0x1d0] sm:$0xff]  ;;  %v571_v13 = vld [vmem:[#allocation6 + $0x1d8] sm:$0xff]  ;;  %v536_v14 = vld [vmem:[#allocation6 + $0xc0] sm:$0xff] }
  0x63   : > { %690 = vmatpush.msra.mxu1 %v619_v49  ;;  %730 = vmatpush.msra.mxu3 %v620_v51  ;;  %v568_v15 = vld [vmem:[#allocation6 + $0x1c0] sm:$0xff]  ;;  %v537_v16 = vld [vmem:[#allocation6 + $0xc8] sm:$0xff]  ;;  %v534_v18 = vld [vmem:[#allocation6 + $0xb0] sm:$0xff] }
  0x64   : > { %671 = vmatpush.msra.mxu0 %v585_v52  ;;  %711 = vmatpush.msra.mxu2 %v586_v54  ;;  %v569_v17 = vld [vmem:[#allocation6 + $0x1c8] sm:$0xff]  ;;  %v566_v19 = vld [vmem:[#allocation6 + $0x1b0] sm:$0xff]  ;;  %v535_v20 = vld [vmem:[#allocation6 + $0xb8] sm:$0xff] }
  0x65   : > { %691 = vmatpush.msra.mxu1 %v617_v53  ;;  %731 = vmatpush.msra.mxu3 %v618_v55  ;;  %v567_v21 = vld [vmem:[#allocation6 + $0x1b8] sm:$0xff]  ;;  %v471_v22 = vld [vmem:[%s2491_s6] sm:$0xff]  ;;  %v533_v30 = vld [vmem:[#allocation6 + $0xa8] sm:$0xff] }
  0x66   : > { %672 = vmatpush.msra.mxu0 %v583_v56  ;;  %712 = vmatpush.msra.mxu2 %v584_v58  ;;  %v473_v23 = vld [vmem:[%s2580_s5] sm:$0x3]  ;;  %v481_v24 = vld [vmem:[#allocation11] sm:$0x3]  ;;  %v565_v31 = vld [vmem:[#allocation6 + $0x1a8] sm:$0xff] }
  0x67   : > { %692 = vmatpush.msra.mxu1 %v615_v57  ;;  %732 = vmatpush.msra.mxu3 %v616_v59  ;;  %v532_v25 = vld [vmem:[#allocation6 + $0xa0] sm:$0xff]  ;;  %v475_v27 = vperm.slane %v473_v23, 0  ;;  %v483_v28 = vperm.slane %v481_v24, 0  ;;  %v476_v29 = vperm.slane %v473_v23, 1  ;;  %v472_v32 = vld [vmem:[%s2491_s6 + $0x8] sm:$0xff]  ;;  %v484_v33 = vperm.slane %v481_v24, 1 }
  0x68   : > { %673 = vmatpush.msra.mxu0 %v581_v61  ;;  %713 = vmatpush.msra.mxu2 %v582_v63  ;;  %v564_v26 = vld [vmem:[#allocation6 + $0x1a0] sm:$0xff]  ;;  %v530_v34 = vld [vmem:[#allocation6 + $0x90] sm:$0xff]  ;;  %v531_v38 = vld [vmem:[#allocation6 + $0x98] sm:$0xff] }
  0x69   : > { %693 = vmatpush.msra.mxu1 %v613_v62  ;;  %733 = vmatpush.msra.mxu3 %v614_v0  ;;  %v562_v35 = vld [vmem:[#allocation6 + $0x190] sm:$0xff]  ;;  %v479_v36 = vmul.f32 %v475_v27, %v471_v22  ;;  %v480_v37 = vmul.f32 %v476_v29, %v472_v32  ;;  %v563_v39 = vld [vmem:[#allocation6 + $0x198] sm:$0xff]  ;;  %v528_v40 = vld [vmem:[#allocation6 + $0x80] sm:$0xff] }
  0x6a   : > { %738 = vmatpush.msrb.mxu0 %v542_v1  ;;  %778 = vmatpush.msrb.mxu2 %v543_v4  ;;  %v560_v41 = vld [vmem:[#allocation6 + $0x180] sm:$0xff]  ;;  %v529_v44 = vld [vmem:[#allocation6 + $0x88] sm:$0xff]  ;;  %v526_v46 = vld [vmem:[#allocation6 + $0x70] sm:$0xff] }
  0x6b   : > { %758 = vmatpush.msrb.mxu1 %v574_v2  ;;  %798 = vmatpush.msrb.mxu3 %v575_v5  ;;  %v487_v42 = vadd.f32 %v483_v28, %v479_v36  ;;  %v488_v43 = vadd.f32 %v484_v33, %v480_v37  ;;  %v561_v45 = vld [vmem:[#allocation6 + $0x188] sm:$0xff]  ;;  %v558_v47 = vld [vmem:[#allocation6 + $0x170] sm:$0xff]  ;;  %v527_v50 = vld [vmem:[#allocation6 + $0x78] sm:$0xff] }
  0x6c   : > { %739 = vmatpush.msrb.mxu0 %v540_v6  ;;  %779 = vmatpush.msrb.mxu2 %v541_v8  ;;  %v559_v51 = vld [vmem:[#allocation6 + $0x178] sm:$0xff]  ;;  %v524_v52 = vld [vmem:[#allocation6 + $0x60] sm:$0xff]  ;;  %v525_v56 = vld [vmem:[#allocation6 + $0x68] sm:$0xff] }
  0x6d   : > { %759 = vmatpush.msrb.mxu1 %v572_v7  ;;  %799 = vmatpush.msrb.mxu3 %v573_v9  ;;  %v489_v48 = vmax.f32 %v487_v42, 0.0  ;;  %v490_v49 = vmax.f32 %v488_v43, 0.0  ;;  %v556_v53 = vld [vmem:[#allocation6 + $0x160] sm:$0xff]  ;;  %v557_v57 = vld [vmem:[#allocation6 + $0x168] sm:$0xff]  ;;  %v522_v58 = vld [vmem:[#allocation6 + $0x50] sm:$0xff] }
  0x6e   : > { %740 = vmatpush.msrb.mxu0 %v538_v10  ;;  %780 = vmatpush.msrb.mxu2 %v539_v12  ;;  %v554_v59 = vld [vmem:[#allocation6 + $0x150] sm:$0xff]  ;;  %v523_v60 = vld [vmem:[#allocation6 + $0x58] sm:$0xff]  ;;  %v520_v62 = vld [vmem:[#allocation6 + $0x40] sm:$0xff] }
  0x6f   : > { %760 = vmatpush.msrb.mxu1 %v570_v11  ;;  %800 = vmatpush.msrb.mxu3 %v571_v13  ;;  %v502_v54 = vrot.slane %v489_v48, 7  ;;  %v503_v55 = vrot.slane %v490_v49, 7  ;;  %v555_v61 = vld [vmem:[#allocation6 + $0x158] sm:$0xff]  ;;  %v552_v63 = vld [vmem:[#allocation6 + $0x140] sm:$0xff]  ;;  %v521_v0 = vld [vmem:[#allocation6 + $0x48] sm:$0xff] }
  0x70   : > { %741 = vmatpush.msrb.mxu0 %v536_v14  ;;  %781 = vmatpush.msrb.mxu2 %v537_v16  ;;  %v553_v1 = vld [vmem:[#allocation6 + $0x148] sm:$0xff]  ;;  %v518_v2 = vld [vmem:[#allocation6 + $0x30] sm:$0xff]  ;;  %v519_v4 = vld [vmem:[#allocation6 + $0x38] sm:$0xff] }
  0x71   : > { %761 = vmatpush.msrb.mxu1 %v568_v15  ;;  %801 = vmatpush.msrb.mxu3 %v569_v17  ;;  %506 = vst [vmem:[#allocation2] sm:$0xfe] %v502_v54  ;;  %v550_v3 = vld [vmem:[#allocation6 + $0x130] sm:$0xff]  ;;  %v551_v5 = vld [vmem:[#allocation6 + $0x138] sm:$0xff]  ;;  %v516_v6 = vld [vmem:[#allocation6 + $0x20] sm:$0xff] }
  0x72   : > { %742 = vmatpush.msrb.mxu0 %v534_v18  ;;  %782 = vmatpush.msrb.mxu2 %v535_v20  ;;  %508 = vst [vmem:[#allocation2 + $0x10] sm:$0x1] %v502_v54  ;;  %v548_v7 = vld [vmem:[#allocation6 + $0x120] sm:$0xff]  ;;  %v517_v9 = vld [vmem:[#allocation6 + $0x28] sm:$0xff]  ;;  %v514_v13 = vld [vmem:[#allocation6 + $0x10] sm:$0xff] }
  0x73   : > { %762 = vmatpush.msrb.mxu1 %v566_v19  ;;  %802 = vmatpush.msrb.mxu3 %v567_v21  ;;  %507 = vst [vmem:[#allocation2 + $0x8] sm:$0xfe] %v503_v55  ;;  %v549_v10 = vld [vmem:[#allocation6 + $0x128] sm:$0xff]  ;;  %v546_v14 = vld [vmem:[#allocation6 + $0x110] sm:$0xff]  ;;  %v547_v17 = vld [vmem:[#allocation6 + $0x118] sm:$0xff] }
  0x74   : > { %743 = vmatpush.msrb.mxu0 %v532_v25  ;;  %783 = vmatpush.msrb.mxu2 %v533_v30  ;;  %509 = vst [vmem:[#allocation2 + $0x18] sm:$0x1] %v503_v55  ;;  %v515_v20 = vld [vmem:[#allocation6 + $0x18] sm:$0xff]  ;;  %v512_v21 = vld [vmem:[#allocation6] sm:$0xff]  ;;  %v513_v25 = vld [vmem:[#allocation6 + $0x8] sm:$0xff] }
  0x75   : > { %763 = vmatpush.msrb.mxu1 %v564_v26  ;;  %803 = vmatpush.msrb.mxu3 %v565_v31  ;;  %v544_v24 = vld [vmem:[#allocation6 + $0x100] sm:$0xff]  ;;  %v545_v26 = vld [vmem:[#allocation6 + $0x108] sm:$0xff]  ;;  %v853_v28 = vld [vmem:[#allocation6 + $0x4f0] sm:$0xff] }
  0x76   : > { %744 = vmatpush.msrb.mxu0 %v530_v34  ;;  %784 = vmatpush.msrb.mxu2 %v531_v38  ;;  %v885_v29 = vld [vmem:[#allocation6 + $0x5f0] sm:$0xff]  ;;  %v854_v30 = vld [vmem:[#allocation6 + $0x4f8] sm:$0xff]  ;;  %v851_v32 = vld [vmem:[#allocation6 + $0x4e0] sm:$0xff] }
  0x77   : > { %764 = vmatpush.msrb.mxu1 %v562_v35  ;;  %804 = vmatpush.msrb.mxu3 %v563_v39  ;;  %v886_v31 = vld [vmem:[#allocation6 + $0x5f8] sm:$0xff]  ;;  %v883_v33 = vld [vmem:[#allocation6 + $0x5e0] sm:$0xff]  ;;  %v884_v35 = vld [vmem:[#allocation6 + $0x5e8] sm:$0xff] }
  0x78   : > { %745 = vmatpush.msrb.mxu0 %v528_v40  ;;  %785 = vmatpush.msrb.mxu2 %v529_v44  ;;  %v576_v8 = vld [vmem:[#allocation2] sm:$0xfe]  ;;  %v852_v36 = vld [vmem:[#allocation6 + $0x4e8] sm:$0xff]  ;;  %v849_v37 = vld [vmem:[#allocation6 + $0x4d0] sm:$0xff] }
  0x79   : > { %765 = vmatpush.msrb.mxu1 %v560_v41  ;;  %805 = vmatpush.msrb.mxu3 %v561_v45  ;;  %v578_v11 = vld [vmem:[#allocation2 + $0x10] sm:$0x1]  ;;  %v650_v12 = vrot.slane %v576_v8, 1  ;;  %v510_v34 = vld [vmem:[#allocation2] sm:$0xff]  ;;  %v850_v40 = vld [vmem:[#allocation6 + $0x4d8] sm:$0xff] }
  0x7a   : > { %746 = vmatpush.msrb.mxu0 %v526_v46  ;;  %786 = vmatpush.msrb.mxu2 %v527_v50  ;;  %v651_v15 = vrot.slane %v578_v11, 1  ;;  %v577_v16 = vld [vmem:[#allocation2 + $0x8] sm:$0xfe]  ;;  %v881_v39 = vld [vmem:[#allocation6 + $0x5d0] sm:$0xff]  ;;  %v882_v41 = vld [vmem:[#allocation6 + $0x5d8] sm:$0xff] }
  0x7b   : > { %766 = vmatpush.msrb.mxu1 %v558_v47  ;;  %806 = vmatpush.msrb.mxu3 %v559_v51  ;;  %v579_v18 = vld [vmem:[#allocation2 + $0x18] sm:$0x1]  ;;  %v653_v19 = vrot.slane %v577_v16, 1  ;;  %v511_v38 = vld [vmem:[#allocation2 + $0x8] sm:$0xff]  ;;  %v847_v42 = vld [vmem:[#allocation6 + $0x4c0] sm:$0xff] }
  0x7c   : > { %747 = vmatpush.msrb.mxu0 %v524_v52  ;;  %787 = vmatpush.msrb.mxu2 %v525_v56  ;;  %v652_v22 = vsel %vm649_vm1, %v650_v12, %v651_v15  ;;  %v654_v23 = vrot.slane %v579_v18, 1  ;;  %v879_v43 = vld [vmem:[#allocation6 + $0x5c0] sm:$0xff]  ;;  %v848_v44 = vld [vmem:[#allocation6 + $0x4c8] sm:$0xff]  ;;  %v877_v46 = vld [vmem:[#allocation6 + $0x5b0] sm:$0xff] }
  0x7d   : > { %767 = vmatpush.msrb.mxu1 %v556_v53  ;;  %807 = vmatpush.msrb.mxu3 %v557_v57  ;;  %v880_v45 = vld [vmem:[#allocation6 + $0x5c8] sm:$0xff]  ;;  %v845_v47 = vld [vmem:[#allocation6 + $0x4b0] sm:$0xff]  ;;  %v846_v48 = vld [vmem:[#allocation6 + $0x4b8] sm:$0xff] }
  0x7e   : > { %748 = vmatpush.msrb.mxu0 %v522_v58  ;;  %788 = vmatpush.msrb.mxu2 %v523_v60  ;;  %v655_v27 = vsel %vm649_vm1, %v653_v19, %v654_v23  ;;  %v878_v49 = vld [vmem:[#allocation6 + $0x5b8] sm:$0xff]  ;;  %v843_v50 = vld [vmem:[#allocation6 + $0x4a0] sm:$0xff]  ;;  %v844_v52 = vld [vmem:[#allocation6 + $0x4a8] sm:$0xff] }
  0x7f   : > { %768 = vmatpush.msrb.mxu1 %v554_v59  ;;  %808 = vmatpush.msrb.mxu3 %v555_v61  ;;  %v875_v51 = vld [vmem:[#allocation6 + $0x5a0] sm:$0xff]  ;;  %v876_v53 = vld [vmem:[#allocation6 + $0x5a8] sm:$0xff]  ;;  %v841_v54 = vld [vmem:[#allocation6 + $0x490] sm:$0xff] }
  0x80   : > { %749 = vmatpush.msrb.mxu0 %v520_v62  ;;  %789 = vmatpush.msrb.mxu2 %v521_v0  ;;  %v873_v55 = vld [vmem:[#allocation6 + $0x590] sm:$0xff]  ;;  %v842_v56 = vld [vmem:[#allocation6 + $0x498] sm:$0xff]  ;;  %v839_v58 = vld [vmem:[#allocation6 + $0x480] sm:$0xff] }
  0x81   : > { %769 = vmatpush.msrb.mxu1 %v552_v63  ;;  %809 = vmatpush.msrb.mxu3 %v553_v1  ;;  %v874_v57 = vld [vmem:[#allocation6 + $0x598] sm:$0xff]  ;;  %v871_v59 = vld [vmem:[#allocation6 + $0x580] sm:$0xff]  ;;  %v840_v60 = vld [vmem:[#allocation6 + $0x488] sm:$0xff] }
  0x82   : > { %750 = vmatpush.msrb.mxu0 %v518_v2  ;;  %790 = vmatpush.msrb.mxu2 %v519_v4  ;;  %v872_v61 = vld [vmem:[#allocation6 + $0x588] sm:$0xff]  ;;  %v837_v62 = vld [vmem:[#allocation6 + $0x470] sm:$0xff]  ;;  %v838_v0 = vld [vmem:[#allocation6 + $0x478] sm:$0xff] }
  0x83   : > { %770 = vmatpush.msrb.mxu1 %v550_v3  ;;  %810 = vmatpush.msrb.mxu3 %v551_v5  ;;  %v869_v63 = vld [vmem:[#allocation6 + $0x570] sm:$0xff]  ;;  %v870_v1 = vld [vmem:[#allocation6 + $0x578] sm:$0xff]  ;;  %v835_v2 = vld [vmem:[#allocation6 + $0x460] sm:$0xff] }
  0x84   : > { %751 = vmatpush.msrb.mxu0 %v516_v6  ;;  %791 = vmatpush.msrb.mxu2 %v517_v9  ;;  %v867_v3 = vld [vmem:[#allocation6 + $0x560] sm:$0xff]  ;;  %v836_v4 = vld [vmem:[#allocation6 + $0x468] sm:$0xff]  ;;  %v833_v6 = vld [vmem:[#allocation6 + $0x450] sm:$0xff] }
  0x85   : > { %771 = vmatpush.msrb.mxu1 %v548_v7  ;;  %811 = vmatpush.msrb.mxu3 %v549_v10  ;;  %v868_v5 = vld [vmem:[#allocation6 + $0x568] sm:$0xff]  ;;  %v865_v7 = vld [vmem:[#allocation6 + $0x550] sm:$0xff]  ;;  %v834_v8 = vld [vmem:[#allocation6 + $0x458] sm:$0xff] }
  0x86   : > { %752 = vmatpush.msrb.mxu0 %v514_v13  ;;  %714 = vmatmul.f32.vlgmr.msra.gmra.mxu2 %v652_v22  ;;  %v866_v9 = vld [vmem:[#allocation6 + $0x558] sm:$0xff]  ;;  %v831_v10 = vld [vmem:[#allocation6 + $0x440] sm:$0xff]  ;;  %v832_v12 = vld [vmem:[#allocation6 + $0x448] sm:$0xff] }
  0x87   : > { %772 = vmatpush.msrb.mxu1 %v546_v14  ;;  %812 = vmatpush.msrb.mxu3 %v547_v17  ;;  %v863_v11 = vld [vmem:[#allocation6 + $0x540] sm:$0xff]  ;;  %v864_v13 = vld [vmem:[#allocation6 + $0x548] sm:$0xff]  ;;  %v829_v14 = vld [vmem:[#allocation6 + $0x430] sm:$0xff] }
  0x88   : > { %792 = vmatpush.msrb.mxu2 %v515_v20  ;;  %753 = vmatpush.msrb.mxu0 %v512_v21  ;;  %v861_v15 = vld [vmem:[#allocation6 + $0x530] sm:$0xff]  ;;  %v830_v16 = vld [vmem:[#allocation6 + $0x438] sm:$0xff]  ;;  %v818_v18 = vld [vmem:[#allocation2] sm:$0xfc] }
  0x89   : > { %734 = vmatmul.f32.vlgmr.msra.gmra.mxu3 %v655_v27  ;;  %773 = vmatpush.msrb.mxu1 %v544_v24  ;;  %v862_v17 = vld [vmem:[#allocation6 + $0x538] sm:$0xff]  ;;  %v820_v19 = vld [vmem:[#allocation2 + $0x10] sm:$0x3]  ;;  %v819_v20 = vld [vmem:[#allocation2 + $0x8] sm:$0xfc] }
  0x8a   : > { %793 = vmatpush.msrb.mxu2 %v513_v25  ;;  %813 = vmatpush.msrb.mxu3 %v545_v26  ;;  %v821_v21 = vld [vmem:[#allocation2 + $0x18] sm:$0x3]  ;;  %v859_v23 = vld [vmem:[#allocation6 + $0x520] sm:$0xff]  ;;  %v828_v24 = vld [vmem:[#allocation6 + $0x428] sm:$0xff] }
  0x8b   : > { %674 = vmatmul.f32.vlgmr.msra.gmra.mxu0 %v652_v22  ;;  %694 = vmatmul.f32.vlgmr.msra.gmra.mxu1 %v655_v27  ;;  %v827_v22 = vld [vmem:[#allocation6 + $0x420] sm:$0xff]  ;;  %v860_v25 = vld [vmem:[#allocation6 + $0x528] sm:$0xff]  ;;  %v825_v26 = vld [vmem:[#allocation6 + $0x410] sm:$0xff] }
  0x8c   : > { %900 = vmatpush.msra.mxu0 %v853_v28  ;;  %920 = vmatpush.msra.mxu1 %v885_v29  ;;  %v857_v27 = vld [vmem:[#allocation6 + $0x510] sm:$0xff]  ;;  %v892_v28 = vrot.slane %v818_v18, 2  ;;  %v893_v29 = vrot.slane %v820_v19, 2  ;;  %v1135_v19 = vld [vmem:[#allocation9 + $0x360] sm:$0xff] }
  0x8d   : > { %940 = vmatpush.msra.mxu2 %v854_v30  ;;  %960 = vmatpush.msra.mxu3 %v886_v31  ;;  %v895_v30 = vrot.slane %v819_v20, 2  ;;  %v896_v31 = vrot.slane %v821_v21, 2  ;;  %v1097_v18 = vld [vmem:[#allocation9 + $0x230] sm:$0xff]  ;;  %v1098_v20 = vld [vmem:[#allocation9 + $0x238] sm:$0xff]  ;;  %v1136_v21 = vld [vmem:[#allocation9 + $0x368] sm:$0xff] }
  0x8e   : > { %901 = vmatpush.msra.mxu0 %v851_v32  ;;  %921 = vmatpush.msra.mxu1 %v883_v33  ;;  %v826_v32 = vld [vmem:[#allocation6 + $0x418] sm:$0xff] }
  0x8f   : > { %794 = vmatmul.f32.vlgmr.msrb.gmra.mxu2 %v510_v34  ;;  %961 = vmatpush.msra.mxu3 %v884_v35  ;;  %v858_v33 = vld [vmem:[#allocation6 + $0x518] sm:$0xff]  ;;  %v855_v35 = vld [vmem:[#allocation6 + $0x500] sm:$0xff] }
  0x90   : > { %941 = vmatpush.msra.mxu2 %v852_v36  ;;  %902 = vmatpush.msra.mxu0 %v849_v37  ;;  %v824_v36 = vld [vmem:[#allocation6 + $0x408] sm:$0xff] }
  0x91   : > { %814 = vmatmul.f32.vlgmr.msrb.gmra.mxu3 %v511_v38  ;;  %922 = vmatpush.msra.mxu1 %v881_v39  ;;  %v856_v37 = vld [vmem:[#allocation6 + $0x508] sm:$0xff]  ;;  %v897_v39 = vsel %vm891_vm2, %v895_v30, %v896_v31  ;;  %v1129_v31 = vld [vmem:[#allocation9 + $0x330] sm:$0xff] }
  0x92   : > { %942 = vmatpush.msra.mxu2 %v850_v40  ;;  %962 = vmatpush.msra.mxu3 %v882_v41  ;;  %v1121_v40 = vld [vmem:[#allocation9 + $0x2f0] sm:$0xff]  ;;  %v1122_v41 = vld [vmem:[#allocation9 + $0x2f8] sm:$0xff]  ;;  %v1091_v30 = vld [vmem:[#allocation9 + $0x200] sm:$0xff] }
  0x93   : > { %903 = vmatpush.msra.mxu0 %v847_v42  ;;  %923 = vmatpush.msra.mxu1 %v879_v43  ;;  %v1119_v42 = vld [vmem:[#allocation9 + $0x2e0] sm:$0xff]  ;;  %v1120_v43 = vld [vmem:[#allocation9 + $0x2e8] sm:$0xff] }
  0x94   : > { %943 = vmatpush.msra.mxu2 %v848_v44  ;;  %963 = vmatpush.msra.mxu3 %v880_v45  ;;  %v1117_v44 = vld [vmem:[#allocation9 + $0x2d0] sm:$0xff]  ;;  %v1118_v45 = vld [vmem:[#allocation9 + $0x2d8] sm:$0xff] }
  0x95   : > { %754 = vmatmul.f32.vlgmr.msrb.gmra.mxu0 %v510_v34  ;;  %924 = vmatpush.msra.mxu1 %v877_v46  ;;  %v823_v34 = vld [vmem:[#allocation6 + $0x400] sm:$0xff] }
  0x96   : > { %904 = vmatpush.msra.mxu0 %v845_v47  ;;  %944 = vmatpush.msra.mxu2 %v846_v48  ;;  %v1115_v46 = vld [vmem:[#allocation9 + $0x2c0] sm:$0xff]  ;;  %v1153_v47 = vld [vmem:[#allocation9 + $0x3f0] sm:$0xff]  ;;  %v1116_v48 = vld [vmem:[#allocation9 + $0x2c8] sm:$0xff] }
  0x97   : > { %964 = vmatpush.msra.mxu3 %v878_v49  ;;  %774 = vmatmul.f32.vlgmr.msrb.gmra.mxu1 %v511_v38  ;;  %v894_v38 = vsel %vm891_vm2, %v892_v28, %v893_v29  ;;  %v1154_v49 = vld [vmem:[#allocation9 + $0x3f8] sm:$0xff]  ;;  %v1132_v29 = vld [vmem:[#allocation9 + $0x348] sm:$0xff] }
  0x98   : > { %905 = vmatpush.msra.mxu0 %v843_v50  ;;  %925 = vmatpush.msra.mxu1 %v875_v51  ;;  %v1113_v50 = vld [vmem:[#allocation9 + $0x2b0] sm:$0xff]  ;;  %v1151_v51 = vld [vmem:[#allocation9 + $0x3e0] sm:$0xff]  ;;  %v1094_v28 = vld [vmem:[#allocation9 + $0x218] sm:$0xff] }
  0x99   : > { %945 = vmatpush.msra.mxu2 %v844_v52  ;;  %965 = vmatpush.msra.mxu3 %v876_v53  ;;  %v1114_v52 = vld [vmem:[#allocation9 + $0x2b8] sm:$0xff]  ;;  %v1152_v53 = vld [vmem:[#allocation9 + $0x3e8] sm:$0xff] }
  0x9a   : > { %906 = vmatpush.msra.mxu0 %v841_v54  ;;  %926 = vmatpush.msra.mxu1 %v873_v55  ;;  %v1111_v54 = vld [vmem:[#allocation9 + $0x2a0] sm:$0xff]  ;;  %v1149_v55 = vld [vmem:[#allocation9 + $0x3d0] sm:$0xff] }
  0x9b   : > { %946 = vmatpush.msra.mxu2 %v842_v56  ;;  %966 = vmatpush.msra.mxu3 %v874_v57  ;;  %v1112_v56 = vld [vmem:[#allocation9 + $0x2a8] sm:$0xff]  ;;  %v1150_v57 = vld [vmem:[#allocation9 + $0x3d8] sm:$0xff] }
  0x9c   : > { %907 = vmatpush.msra.mxu0 %v839_v58  ;;  %927 = vmatpush.msra.mxu1 %v871_v59  ;;  %v1109_v58 = vld [vmem:[#allocation9 + $0x290] sm:$0xff]  ;;  %v1147_v59 = vld [vmem:[#allocation9 + $0x3c0] sm:$0xff] }
  0x9d   : > { %947 = vmatpush.msra.mxu2 %v840_v60  ;;  %967 = vmatpush.msra.mxu3 %v872_v61  ;;  %v1110_v60 = vld [vmem:[#allocation9 + $0x298] sm:$0xff]  ;;  %v1148_v61 = vld [vmem:[#allocation9 + $0x3c8] sm:$0xff] }
  0x9e   : > { %908 = vmatpush.msra.mxu0 %v837_v62  ;;  %928 = vmatpush.msra.mxu1 %v869_v63  ;;  %v1107_v62 = vld [vmem:[#allocation9 + $0x280] sm:$0xff]  ;;  %v1145_v63 = vld [vmem:[#allocation9 + $0x3b0] sm:$0xff] }
  0x9f   : > { %948 = vmatpush.msra.mxu2 %v838_v0  ;;  %968 = vmatpush.msra.mxu3 %v870_v1  ;;  %v1108_v0 = vld [vmem:[#allocation9 + $0x288] sm:$0xff]  ;;  %v1146_v1 = vld [vmem:[#allocation9 + $0x3b8] sm:$0xff] }
  0xa0   : > { %909 = vmatpush.msra.mxu0 %v835_v2  ;;  %929 = vmatpush.msra.mxu1 %v867_v3  ;;  %v1105_v2 = vld [vmem:[#allocation9 + $0x270] sm:$0xff]  ;;  %v1143_v3 = vld [vmem:[#allocation9 + $0x3a0] sm:$0xff] }
  0xa1   : > { %949 = vmatpush.msra.mxu2 %v836_v4  ;;  %969 = vmatpush.msra.mxu3 %v868_v5  ;;  %v1106_v4 = vld [vmem:[#allocation9 + $0x278] sm:$0xff]  ;;  %v1144_v5 = vld [vmem:[#allocation9 + $0x3a8] sm:$0xff] }
  0xa2   : > { %910 = vmatpush.msra.mxu0 %v833_v6  ;;  %930 = vmatpush.msra.mxu1 %v865_v7  ;;  %v1103_v6 = vld [vmem:[#allocation9 + $0x260] sm:$0xff]  ;;  %v1141_v7 = vld [vmem:[#allocation9 + $0x390] sm:$0xff] }
  0xa3   : > { %950 = vmatpush.msra.mxu2 %v834_v8  ;;  %970 = vmatpush.msra.mxu3 %v866_v9  ;;  %v1104_v8 = vld [vmem:[#allocation9 + $0x268] sm:$0xff]  ;;  %v1142_v9 = vld [vmem:[#allocation9 + $0x398] sm:$0xff] }
  0xa4   : > { %911 = vmatpush.msra.mxu0 %v831_v10  ;;  %931 = vmatpush.msra.mxu1 %v863_v11  ;;  %v1101_v10 = vld [vmem:[#allocation9 + $0x250] sm:$0xff]  ;;  %v1139_v11 = vld [vmem:[#allocation9 + $0x380] sm:$0xff] }
  0xa5   : > { %951 = vmatpush.msra.mxu2 %v832_v12  ;;  %971 = vmatpush.msra.mxu3 %v864_v13  ;;  %v1102_v12 = vld [vmem:[#allocation9 + $0x258] sm:$0xff]  ;;  %v1140_v13 = vld [vmem:[#allocation9 + $0x388] sm:$0xff] }
  0xa6   : > { %912 = vmatpush.msra.mxu0 %v829_v14  ;;  %932 = vmatpush.msra.mxu1 %v861_v15  ;;  %v1099_v14 = vld [vmem:[#allocation9 + $0x240] sm:$0xff]  ;;  %v1137_v15 = vld [vmem:[#allocation9 + $0x370] sm:$0xff] }
  0xa7   : > { %952 = vmatpush.msra.mxu2 %v830_v16  ;;  %972 = vmatpush.msra.mxu3 %v862_v17  ;;  %v1100_v16 = vld [vmem:[#allocation9 + $0x248] sm:$0xff]  ;;  %v1138_v17 = vld [vmem:[#allocation9 + $0x378] sm:$0xff] }
  0xa8   : > { %913 = vmatpush.msra.mxu0 %v827_v22  ;;  %933 = vmatpush.msra.mxu1 %v859_v23  ;;  %v1095_v22 = vld [vmem:[#allocation9 + $0x220] sm:$0xff]  ;;  %v1133_v23 = vld [vmem:[#allocation9 + $0x350] sm:$0xff] }
  0xa9   : > { %953 = vmatpush.msra.mxu2 %v828_v24  ;;  %973 = vmatpush.msra.mxu3 %v860_v25  ;;  %v1096_v24 = vld [vmem:[#allocation9 + $0x228] sm:$0xff]  ;;  %v1134_v25 = vld [vmem:[#allocation9 + $0x358] sm:$0xff] }
  0xaa   : > { %914 = vmatpush.msra.mxu0 %v825_v26  ;;  %934 = vmatpush.msra.mxu1 %v857_v27  ;;  %v1093_v26 = vld [vmem:[#allocation9 + $0x210] sm:$0xff]  ;;  %v1131_v27 = vld [vmem:[#allocation9 + $0x340] sm:$0xff] }
  0xab   : > { %954 = vmatpush.msra.mxu2 %v826_v32  ;;  %974 = vmatpush.msra.mxu3 %v858_v33  ;;  %v1092_v32 = vld [vmem:[#allocation9 + $0x208] sm:$0xff]  ;;  %v1130_v33 = vld [vmem:[#allocation9 + $0x338] sm:$0xff] }
  0xac   : > { %915 = vmatpush.msra.mxu0 %v823_v34  ;;  %935 = vmatpush.msra.mxu1 %v855_v35  ;;  %v1052_v34 = vld [vmem:[#allocation9 + $0xf0] sm:$0xff]  ;;  %v1053_v35 = vld [vmem:[#allocation9 + $0xf8] sm:$0xff] }
  0xad   : > { %955 = vmatpush.msra.mxu2 %v824_v36  ;;  %975 = vmatpush.msra.mxu3 %v856_v37  ;;  %v1127_v36 = vld [vmem:[#allocation9 + $0x320] sm:$0xff]  ;;  %v1128_v37 = vld [vmem:[#allocation9 + $0x328] sm:$0xff] }
  0xae   : > { %916 = vmatmul.f32.vlgmr.msra.gmra.mxu0 %v894_v38  ;;  %936 = vmatmul.f32.vlgmr.msra.gmra.mxu1 %v897_v39 }
  0xaf   : > { %956 = vmatmul.f32.vlgmr.msra.gmra.mxu2 %v894_v38  ;;  %976 = vmatmul.f32.vlgmr.msra.gmra.mxu3 %v897_v39  ;;  %v1050_v38 = vld [vmem:[#allocation9 + $0xe0] sm:$0xff]  ;;  %v1051_v39 = vld [vmem:[#allocation9 + $0xe8] sm:$0xff] }
  0xb0   : > { %1167 = vmatpush.msrb.mxu0 %v1121_v40  ;;  %1207 = vmatpush.msrb.mxu2 %v1122_v41  ;;  %v1125_v40 = vld [vmem:[#allocation9 + $0x310] sm:$0xff]  ;;  %v1126_v41 = vld [vmem:[#allocation9 + $0x318] sm:$0xff] }
  0xb1   : > { %1187 = vmatpush.msrb.mxu1 %v1153_v47  ;;  %1227 = vmatpush.msrb.mxu3 %v1154_v49  ;;  %v1084_v47 = vld [vmem:[#allocation9 + $0x1f0] sm:$0xff]  ;;  %v1085_v49 = vld [vmem:[#allocation9 + $0x1f8] sm:$0xff] }
  0xb2   : > { %1168 = vmatpush.msrb.mxu0 %v1119_v42  ;;  %1208 = vmatpush.msrb.mxu2 %v1120_v43  ;;  %v1048_v42 = vld [vmem:[#allocation9 + $0xd0] sm:$0xff]  ;;  %v1049_v43 = vld [vmem:[#allocation9 + $0xd8] sm:$0xff] }
  0xb3   : > { %1188 = vmatpush.msrb.mxu1 %v1151_v51  ;;  %1228 = vmatpush.msrb.mxu3 %v1152_v53  ;;  %v1082_v51 = vld [vmem:[#allocation9 + $0x1e0] sm:$0xff]  ;;  %v1083_v53 = vld [vmem:[#allocation9 + $0x1e8] sm:$0xff] }
  0xb4   : > { %1169 = vmatpush.msrb.mxu0 %v1117_v44  ;;  %1209 = vmatpush.msrb.mxu2 %v1118_v45  ;;  %v1123_v44 = vld [vmem:[#allocation9 + $0x300] sm:$0xff]  ;;  %v1124_v45 = vld [vmem:[#allocation9 + $0x308] sm:$0xff] }
  0xb5   : > { %1189 = vmatpush.msrb.mxu1 %v1149_v55  ;;  %1229 = vmatpush.msrb.mxu3 %v1150_v57  ;;  %v1080_v55 = vld [vmem:[#allocation9 + $0x1d0] sm:$0xff]  ;;  %v1081_v57 = vld [vmem:[#allocation9 + $0x1d8] sm:$0xff] }
  0xb6   : > { %1170 = vmatpush.msrb.mxu0 %v1115_v46  ;;  %1210 = vmatpush.msrb.mxu2 %v1116_v48  ;;  %v1046_v46 = vld [vmem:[#allocation9 + $0xc0] sm:$0xff]  ;;  %v1047_v48 = vld [vmem:[#allocation9 + $0xc8] sm:$0xff] }
  0xb7   : > { %1190 = vmatpush.msrb.mxu1 %v1147_v59  ;;  %1230 = vmatpush.msrb.mxu3 %v1148_v61  ;;  %v1078_v59 = vld [vmem:[#allocation9 + $0x1c0] sm:$0xff]  ;;  %v1079_v61 = vld [vmem:[#allocation9 + $0x1c8] sm:$0xff] }
  0xb8   : > { %1171 = vmatpush.msrb.mxu0 %v1113_v50  ;;  %1211 = vmatpush.msrb.mxu2 %v1114_v52  ;;  %v1044_v50 = vld [vmem:[#allocation9 + $0xb0] sm:$0xff]  ;;  %v1045_v52 = vld [vmem:[#allocation9 + $0xb8] sm:$0xff] }
  0xb9   : > { %1191 = vmatpush.msrb.mxu1 %v1145_v63  ;;  %1231 = vmatpush.msrb.mxu3 %v1146_v1  ;;  %v1076_v63 = vld [vmem:[#allocation9 + $0x1b0] sm:$0xff]  ;;  %v1077_v1 = vld [vmem:[#allocation9 + $0x1b8] sm:$0xff] }
  0xba   : > { %1172 = vmatpush.msrb.mxu0 %v1111_v54  ;;  %1212 = vmatpush.msrb.mxu2 %v1112_v56  ;;  %v1042_v54 = vld [vmem:[#allocation9 + $0xa0] sm:$0xff]  ;;  %v1043_v56 = vld [vmem:[#allocation9 + $0xa8] sm:$0xff] }
  0xbb   : > { %1192 = vmatpush.msrb.mxu1 %v1143_v3  ;;  %1232 = vmatpush.msrb.mxu3 %v1144_v5  ;;  %v1074_v5 = vld [vmem:[#allocation9 + $0x1a0] sm:$0xff] }
  0xbc   : > { %1173 = vmatpush.msrb.mxu0 %v1109_v58  ;;  %1213 = vmatpush.msrb.mxu2 %v1110_v60  ;;  %v1040_v58 = vld [vmem:[#allocation9 + $0x90] sm:$0xff]  ;;  %v1041_v60 = vld [vmem:[#allocation9 + $0x98] sm:$0xff] }
  0xbd   : > { %1193 = vmatpush.msrb.mxu1 %v1141_v7  ;;  %1233 = vmatpush.msrb.mxu3 %v1142_v9  ;;  %v1075_v7 = vld [vmem:[#allocation9 + $0x1a8] sm:$0xff]  ;;  %v1072_v9 = vld [vmem:[#allocation9 + $0x190] sm:$0xff] }
  0xbe   : > { %1174 = vmatpush.msrb.mxu0 %v1107_v62  ;;  %1214 = vmatpush.msrb.mxu2 %v1108_v0  ;;  %v1038_v62 = vld [vmem:[#allocation9 + $0x80] sm:$0xff]  ;;  %v1039_v0 = vld [vmem:[#allocation9 + $0x88] sm:$0xff] }
  0xbf   : > { %1194 = vmatpush.msrb.mxu1 %v1139_v11  ;;  %1234 = vmatpush.msrb.mxu3 %v1140_v13  ;;  %v1073_v11 = vld [vmem:[#allocation9 + $0x198] sm:$0xff]  ;;  %v1070_v13 = vld [vmem:[#allocation9 + $0x180] sm:$0xff] }
  0xc0   : > { %1175 = vmatpush.msrb.mxu0 %v1105_v2  ;;  %1215 = vmatpush.msrb.mxu2 %v1106_v4  ;;  %v1036_v4 = vld [vmem:[#allocation9 + $0x70] sm:$0xff] }
  0xc1   : > { %1195 = vmatpush.msrb.mxu1 %v1137_v15  ;;  %1235 = vmatpush.msrb.mxu3 %v1138_v17  ;;  %v1071_v15 = vld [vmem:[#allocation9 + $0x188] sm:$0xff]  ;;  %v1068_v17 = vld [vmem:[#allocation9 + $0x170] sm:$0xff] }
  0xc2   : > { %1176 = vmatpush.msrb.mxu0 %v1103_v6  ;;  %1216 = vmatpush.msrb.mxu2 %v1104_v8  ;;  %v1037_v6 = vld [vmem:[#allocation9 + $0x78] sm:$0xff]  ;;  %v1034_v8 = vld [vmem:[#allocation9 + $0x60] sm:$0xff] }
  0xc3   : > { %1196 = vmatpush.msrb.mxu1 %v1135_v19  ;;  %1236 = vmatpush.msrb.mxu3 %v1136_v21  ;;  %v1069_v21 = vld [vmem:[#allocation9 + $0x178] sm:$0xff] }
  0xc4   : > { %1177 = vmatpush.msrb.mxu0 %v1101_v10  ;;  %1217 = vmatpush.msrb.mxu2 %v1102_v12  ;;  %v1035_v10 = vld [vmem:[#allocation9 + $0x68] sm:$0xff]  ;;  %v1032_v12 = vld [vmem:[#allocation9 + $0x50] sm:$0xff] }
  0xc5   : > { %1197 = vmatpush.msrb.mxu1 %v1133_v23  ;;  %1237 = vmatpush.msrb.mxu3 %v1134_v25  ;;  %v1066_v23 = vld [vmem:[#allocation9 + $0x160] sm:$0xff]  ;;  %v1067_v25 = vld [vmem:[#allocation9 + $0x168] sm:$0xff] }
  0xc6   : > { %1178 = vmatpush.msrb.mxu0 %v1099_v14  ;;  %1218 = vmatpush.msrb.mxu2 %v1100_v16  ;;  %v1033_v14 = vld [vmem:[#allocation9 + $0x58] sm:$0xff]  ;;  %v1030_v16 = vld [vmem:[#allocation9 + $0x40] sm:$0xff] }
  0xc7   : > { %1198 = vmatpush.msrb.mxu1 %v1131_v27  ;;  %1238 = vmatpush.msrb.mxu3 %v1132_v29  ;;  %v1064_v29 = vld [vmem:[#allocation9 + $0x150] sm:$0xff] }
  0xc8   : > { %1179 = vmatpush.msrb.mxu0 %v1097_v18  ;;  %1219 = vmatpush.msrb.mxu2 %v1098_v20  ;;  %v1031_v18 = vld [vmem:[#allocation9 + $0x48] sm:$0xff] }
  0xc9   : > { %1199 = vmatpush.msrb.mxu1 %v1129_v31  ;;  %1239 = vmatpush.msrb.mxu3 %v1130_v33  ;;  %v1024_v33 = vld [vmem:[#allocation9 + $0x10] sm:$0xff] }
  0xca   : > { %1180 = vmatpush.msrb.mxu0 %v1095_v22  ;;  %1220 = vmatpush.msrb.mxu2 %v1096_v24  ;;  %v1028_v22 = vld [vmem:[#allocation9 + $0x30] sm:$0xff]  ;;  %v1029_v24 = vld [vmem:[#allocation9 + $0x38] sm:$0xff] }
  0xcb   : > { %1200 = vmatpush.msrb.mxu1 %v1127_v36  ;;  %1240 = vmatpush.msrb.mxu3 %v1128_v37  ;;  %v1063_v36 = vld [vmem:[#allocation9 + $0x148] sm:$0xff]  ;;  %v1022_v37 = vld [vmem:[#allocation9] sm:$0xff] }
  0xcc   : > { %1181 = vmatpush.msrb.mxu0 %v1093_v26  ;;  %1221 = vmatpush.msrb.mxu2 %v1094_v28  ;;  %v1026_v28 = vld [vmem:[#allocation9 + $0x20] sm:$0xff] }
  0xcd   : > { %1201 = vmatpush.msrb.mxu1 %v1125_v40  ;;  %1241 = vmatpush.msrb.mxu3 %v1126_v41  ;;  %v1061_v40 = vld [vmem:[#allocation9 + $0x138] sm:$0xff] }
  0xce   : > { %1182 = vmatpush.msrb.mxu0 %v1091_v30  ;;  %1222 = vmatpush.msrb.mxu2 %v1092_v32  ;;  %v1027_v30 = vld [vmem:[#allocation9 + $0x28] sm:$0xff]  ;;  %v1065_v32 = vld [vmem:[#allocation9 + $0x158] sm:$0xff] }
  0xcf   : > { %1202 = vmatpush.msrb.mxu1 %v1123_v44  ;;  %1242 = vmatpush.msrb.mxu3 %v1124_v45  ;;  %v1059_v44 = vld [vmem:[#allocation9 + $0x128] sm:$0xff] }
  0xd0   : > { %1247 = vmatpush.msra.mxu0 %v1052_v34  ;;  %1287 = vmatpush.msra.mxu2 %v1053_v35  ;;  %v1062_v34 = vld [vmem:[#allocation9 + $0x140] sm:$0xff]  ;;  %v1025_v35 = vld [vmem:[#allocation9 + $0x18] sm:$0xff] }
  0xd1   : > { %1267 = vmatpush.msra.mxu1 %v1084_v47  ;;  %1307 = vmatpush.msra.mxu3 %v1085_v49 }
  0xd2   : > { %1248 = vmatpush.msra.mxu0 %v1050_v38  ;;  %1288 = vmatpush.msra.mxu2 %v1051_v39  ;;  %v1060_v38 = vld [vmem:[#allocation9 + $0x130] sm:$0xff]  ;;  %v1023_v39 = vld [vmem:[#allocation9 + $0x8] sm:$0xff] }
  0xd3   : > { %1268 = vmatpush.msra.mxu1 %v1082_v51  ;;  %1308 = vmatpush.msra.mxu3 %v1083_v53  ;;  %v1057_v51 = vld [vmem:[#allocation9 + $0x118] sm:$0xff] }
  0xd4   : > { %1249 = vmatpush.msra.mxu0 %v1048_v42  ;;  %1289 = vmatpush.msra.mxu2 %v1049_v43  ;;  %v982_v42 = vld [vmem:[#allocation8] sm:$0x3]  ;;  %v1058_v43 = vld [vmem:[#allocation9 + $0x120] sm:$0xff] }
  0xd5   : > { %1269 = vmatpush.msra.mxu1 %v1080_v55  ;;  %1309 = vmatpush.msra.mxu3 %v1081_v57  ;;  %v992_v55 = vld [vmem:[%s2582_s7] sm:$0x3]  ;;  %v1055_v57 = vld [vmem:[#allocation9 + $0x108] sm:$0xff] }
  0xd6   : > { %1250 = vmatpush.msra.mxu0 %v1046_v46  ;;  %1290 = vmatpush.msra.mxu2 %v1047_v48 }
  0xd7   : > { %1270 = vmatpush.msra.mxu1 %v1078_v59  ;;  %1310 = vmatpush.msra.mxu3 %v1079_v61 }
  0xd8   : > { %1251 = vmatpush.msra.mxu0 %v1044_v50  ;;  %1291 = vmatpush.msra.mxu2 %v1045_v52  ;;  %v1056_v50 = vld [vmem:[#allocation9 + $0x110] sm:$0xff] }
  0xd9   : > { %1271 = vmatpush.msra.mxu1 %v1076_v63  ;;  %1311 = vmatpush.msra.mxu3 %v1077_v1 }
  0xda   : > { %1252 = vmatpush.msra.mxu0 %v1042_v54  ;;  %1292 = vmatpush.msra.mxu2 %v1043_v56  ;;  %v984_v54 = vperm.slane %v982_v42, 0  ;;  %v1054_v56 = vld [vmem:[#allocation9 + $0x100] sm:$0xff] }
  0xdb   : > { %1272 = vmatpush.msra.mxu1 %v1074_v5  ;;  %1312 = vmatpush.msra.mxu3 %v1075_v7  ;;  %v985_v5 = vperm.slane %v982_v42, 1  ;;  %v1355_v42 = vld [vmem:[#allocation9 + $0x4b8] sm:$0xff] }
  0xdc   : > { %1253 = vmatpush.msra.mxu0 %v1040_v58  ;;  %1293 = vmatpush.msra.mxu2 %v1041_v60  ;;  %v1000_v60 = vld [vmem:[#allocation12] sm:$0x3] }
  0xdd   : > { %1273 = vmatpush.msra.mxu1 %v1072_v9  ;;  %1313 = vmatpush.msra.mxu3 %v1073_v11 }
  0xde   : > { %1254 = vmatpush.msra.mxu0 %v1038_v62  ;;  %1294 = vmatpush.msra.mxu2 %v1039_v0  ;;  %v994_v62 = vperm.slane %v992_v55, 0  ;;  %v1002_v0 = vperm.slane %v1000_v60, 0 }
  0xdf   : > { %1274 = vmatpush.msra.mxu1 %v1070_v13  ;;  %1314 = vmatpush.msra.mxu3 %v1071_v15  ;;  %v1003_v13 = vperm.slane %v1000_v60, 1  ;;  %v1385_v60 = vld [vmem:[#allocation9 + $0x5a8] sm:$0xff] }
  0xe0   : > { %1255 = vmatpush.msra.mxu0 %v1036_v4  ;;  %1295 = vmatpush.msra.mxu2 %v1037_v6 }
  0xe1   : > { %1275 = vmatpush.msra.mxu1 %v1068_v17  ;;  %1315 = vmatpush.msra.mxu3 %v1069_v21 }
  0xe2   : > { %1256 = vmatpush.msra.mxu0 %v1034_v8  ;;  %1296 = vmatpush.msra.mxu2 %v1035_v10  ;;  %v995_v10 = vperm.slane %v992_v55, 1  ;;  %v1349_v55 = vld [vmem:[#allocation9 + $0x488] sm:$0xff] }
  0xe3   : > { %1276 = vmatpush.msra.mxu1 %v1066_v23  ;;  %1316 = vmatpush.msra.mxu3 %v1067_v25  ;;  %v1362_v23 = vld [vmem:[#allocation9 + $0x4f0] sm:$0xff] }
  0xe4   : > { %1257 = vmatpush.msra.mxu0 %v1032_v12  ;;  %1297 = vmatpush.msra.mxu2 %v1033_v14 }
  0xe5   : > { %1277 = vmatpush.msra.mxu1 %v1064_v29  ;;  %1317 = vmatpush.msra.mxu3 %v1065_v32  ;;  %v1359_v29 = vld [vmem:[#allocation9 + $0x4d8] sm:$0xff] }
  0xe6   : > { %1258 = vmatpush.msra.mxu0 %v1030_v16  ;;  %1298 = vmatpush.msra.mxu2 %v1031_v18 }
  0xe7   : > { %1278 = vmatpush.msra.mxu1 %v1062_v34  ;;  %1318 = vmatpush.msra.mxu3 %v1063_v36  ;;  %v1356_v34 = vld [vmem:[#allocation9 + $0x4c0] sm:$0xff] }
  0xe8   : > { %1259 = vmatpush.msra.mxu0 %v1028_v22  ;;  %1299 = vmatpush.msra.mxu2 %v1029_v24  ;;  %v1363_v24 = vld [vmem:[#allocation9 + $0x4f8] sm:$0xff] }
  0xe9   : > { %1279 = vmatpush.msra.mxu1 %v1060_v38  ;;  %1319 = vmatpush.msra.mxu3 %v1061_v40  ;;  %v1395_v38 = vld [vmem:[#allocation9 + $0x5f8] sm:$0xff]  ;;  %v1392_v40 = vld [vmem:[#allocation9 + $0x5e0] sm:$0xff] }
  0xea   : > { %1260 = vmatpush.msra.mxu0 %v1026_v28  ;;  %1300 = vmatpush.msra.mxu2 %v1027_v30  ;;  %v1358_v28 = vld [vmem:[#allocation9 + $0x4d0] sm:$0xff] }
  0xeb   : > { %1280 = vmatpush.msra.mxu1 %v1058_v43  ;;  %1320 = vmatpush.msra.mxu3 %v1059_v44  ;;  %v1393_v43 = vld [vmem:[#allocation9 + $0x5e8] sm:$0xff]  ;;  %v1352_v44 = vld [vmem:[#allocation9 + $0x4a0] sm:$0xff] }
  0xec   : > { %1261 = vmatpush.msra.mxu0 %v1024_v33  ;;  %1301 = vmatpush.msra.mxu2 %v1025_v35  ;;  %v1394_v35 = vld [vmem:[#allocation9 + $0x5f0] sm:$0xff] }
  0xed   : > { %1281 = vmatpush.msra.mxu1 %v1056_v50  ;;  %1321 = vmatpush.msra.mxu3 %v1057_v51  ;;  %v1351_v50 = vld [vmem:[#allocation9 + $0x498] sm:$0xff]  ;;  %v1389_v51 = vld [vmem:[#allocation9 + $0x5c8] sm:$0xff] }
  0xee   : > { %1262 = vmatpush.msra.mxu0 %v1022_v37  ;;  %1302 = vmatpush.msra.mxu2 %v1023_v39  ;;  %v1357_v37 = vld [vmem:[#allocation9 + $0x4c8] sm:$0xff]  ;;  %v1354_v39 = vld [vmem:[#allocation9 + $0x4b0] sm:$0xff] }
  0xef   : > { %1282 = vmatpush.msra.mxu1 %v1054_v56  ;;  %1322 = vmatpush.msra.mxu3 %v1055_v57  ;;  %v1387_v56 = vld [vmem:[#allocation9 + $0x5b8] sm:$0xff]  ;;  %v1346_v57 = vld [vmem:[#allocation9 + $0x470] sm:$0xff] }
 0x108   : > { %v675_v2 = vpop.f32.mrf.mxu0  ;;  %v695_v3 = vpop.f32.mrf.mxu1 }
 0x109   : > { %v715_v19 = vpop.f32.mrf.mxu2  ;;  %v696_v31 = vadd.f32 %v695_v3, %v675_v2 }
 0x10c   : > { %v735_v20 = vpop.f32.mrf.mxu3 }
 0x10d   : > { %v736_v47 = vadd.f32 %v735_v20, %v715_v19 }
 0x112   : > { %v755_v26 = vpop.f32.mrf.mxu0  ;;  %v795_v45 = vpop.f32.mrf.mxu2 }
 0x113   : > { %v756_v41 = vadd.f32 %v755_v26, %v696_v31  ;;  %v796_v59 = vadd.f32 %v795_v45, %v736_v47  ;;  %v1360_v26 = vld [vmem:[#allocation9 + $0x4e0] sm:$0xff]  ;;  %v1390_v45 = vld [vmem:[#allocation9 + $0x5d0] sm:$0xff]  ;;  %v1391_v47 = vld [vmem:[#allocation9 + $0x5d8] sm:$0xff] }
 0x114   : > { %v775_v27 = vpop.f32.mrf.mxu1  ;;  %v815_v46 = vpop.f32.mrf.mxu3 }
 0x115   : > { %v776_v52 = vadd.f32 %v775_v27, %v756_v41  ;;  %v816_v3 = vadd.f32 %v815_v46, %v796_v59  ;;  %v1361_v27 = vld [vmem:[#allocation9 + $0x4e8] sm:$0xff]  ;;  %v1347_v59 = vld [vmem:[#allocation9 + $0x478] sm:$0xff] }
 0x116   : > { %v1353_v46 = vld [vmem:[#allocation9 + $0x4a8] sm:$0xff] }
 0x12b   : > { %v917_v48 = vpop.f32.mrf.mxu0  ;;  %v937_v49 = vpop.f32.mrf.mxu1 }
 0x12c   : > { %v938_v53 = vadd.f32 %v937_v49, %v917_v48  ;;  %v1350_v48 = vld [vmem:[#allocation9 + $0x490] sm:$0xff]  ;;  %v1388_v49 = vld [vmem:[#allocation9 + $0x5c0] sm:$0xff] }
 0x12e   : > { %v980_v58 = vadd.f32 %v938_v53, %v776_v52  ;;  %v1348_v52 = vld [vmem:[#allocation9 + $0x480] sm:$0xff]  ;;  %v1386_v53 = vld [vmem:[#allocation9 + $0x5b0] sm:$0xff] }
 0x130   : > { %v988_v61 = vadd.f32 %v984_v54, %v980_v58  ;;  %v1384_v58 = vld [vmem:[#allocation9 + $0x5a0] sm:$0xff] }
 0x132   : > { %v990_v63 = vmax.f32 %v988_v61, 0.0  ;;  %v957_v1 = vpop.f32.mrf.mxu2  ;;  %v977_v2 = vpop.f32.mrf.mxu3  ;;  %v1344_v61 = vld [vmem:[#allocation9 + $0x460] sm:$0xff] }
 0x133   : > { %v978_v4 = vadd.f32 %v977_v2, %v957_v1  ;;  %v1342_v1 = vld [vmem:[#allocation9 + $0x450] sm:$0xff]  ;;  %v1380_v2 = vld [vmem:[#allocation9 + $0x580] sm:$0xff] }
 0x134   : > { %v998_v6 = vmul.f32 %v994_v62, %v990_v63  ;;  %v1382_v62 = vld [vmem:[#allocation9 + $0x590] sm:$0xff]  ;;  %v1345_v63 = vld [vmem:[#allocation9 + $0x468] sm:$0xff] }
 0x135   : > { %v981_v7 = vadd.f32 %v978_v4, %v816_v3  ;;  %v1343_v3 = vld [vmem:[#allocation9 + $0x458] sm:$0xff]  ;;  %v1381_v4 = vld [vmem:[#allocation9 + $0x588] sm:$0xff] }
 0x136   : > { %v1006_v8 = vadd.f32 %v1002_v0, %v998_v6  ;;  %v1383_v0 = vld [vmem:[#allocation9 + $0x598] sm:$0xff]  ;;  %v1378_v6 = vld [vmem:[#allocation9 + $0x570] sm:$0xff] }
 0x137   : > { %v989_v9 = vadd.f32 %v985_v5, %v981_v7  ;;  %v1340_v5 = vld [vmem:[#allocation9 + $0x440] sm:$0xff]  ;;  %v1341_v7 = vld [vmem:[#allocation9 + $0x448] sm:$0xff] }
 0x138   : > { %v1008_v11 = vmax.f32 %v1006_v8, 0.0  ;;  %v1379_v8 = vld [vmem:[#allocation9 + $0x578] sm:$0xff] }
 0x139   : > { %v991_v12 = vmax.f32 %v989_v9, 0.0  ;;  %v1338_v9 = vld [vmem:[#allocation9 + $0x430] sm:$0xff] }
 0x13a   : > { %v1012_v14 = vrot.slane %v1008_v11, 7  ;;  %v1339_v11 = vld [vmem:[#allocation9 + $0x438] sm:$0xff] }
 0x13b   : > { %v999_v15 = vmul.f32 %v995_v10, %v991_v12  ;;  %v1376_v10 = vld [vmem:[#allocation9 + $0x560] sm:$0xff]  ;;  %v1377_v12 = vld [vmem:[#allocation9 + $0x568] sm:$0xff] }
 0x13c   : > { %1016 = vst [vmem:[#allocation2] sm:$0xfe] %v1012_v14 }
 0x13d   : > { %1018 = vst [vmem:[#allocation2 + $0x10] sm:$0x1] %v1012_v14  ;;  %v1007_v16 = vadd.f32 %v1003_v13, %v999_v15  ;;  %v1336_v13 = vld [vmem:[#allocation9 + $0x420] sm:$0xff]  ;;  %v1374_v14 = vld [vmem:[#allocation9 + $0x550] sm:$0xff]  ;;  %v1337_v15 = vld [vmem:[#allocation9 + $0x428] sm:$0xff] }
 0x13f   : > { %v1009_v17 = vmax.f32 %v1007_v16, 0.0  ;;  %v1375_v16 = vld [vmem:[#allocation9 + $0x558] sm:$0xff] }
 0x141   : > { %v1013_v18 = vrot.slane %v1009_v17, 7 }
 0x143   : > { %1017 = vst [vmem:[#allocation2 + $0x8] sm:$0xfe] %v1013_v18  ;;  %v1086_v19 = vld [vmem:[#allocation2] sm:$0xfe] }
 0x144   : > { %1019 = vst [vmem:[#allocation2 + $0x18] sm:$0x1] %v1013_v18  ;;  %v1088_v20 = vld [vmem:[#allocation2 + $0x10] sm:$0x1]  ;;  %v1159_v21 = vrot.slane %v1086_v19, 1  ;;  %v1020_v41 = vld [vmem:[#allocation2] sm:$0xff] }
 0x145   : > { %v1160_v22 = vrot.slane %v1088_v20, 1  ;;  %v1327_v17 = vld [vmem:[#allocation2] sm:$0xfc]  ;;  %v1329_v18 = vld [vmem:[#allocation2 + $0x10] sm:$0x3]  ;;  %v1334_v19 = vld [vmem:[#allocation9 + $0x410] sm:$0xff] }
 0x146   : > { %v1372_v20 = vld [vmem:[#allocation9 + $0x540] sm:$0xff] }
 0x147   : > { %v1161_v25 = vsel %vm649_vm1, %v1159_v21, %v1160_v22  ;;  %v1335_v21 = vld [vmem:[#allocation9 + $0x418] sm:$0xff]  ;;  %v1373_v22 = vld [vmem:[#allocation9 + $0x548] sm:$0xff] }
 0x148   : > { %1183 = vmatmul.f32.vlgmr.msrb.gmra.mxu0 %v1161_v25  ;;  %1223 = vmatmul.f32.vlgmr.msrb.gmra.mxu2 %v1161_v25  ;;  %v1400_v25 = vrot.slane %v1327_v17, 2  ;;  %v1519_v17 = vld [vmem:[#allocation14 + $0x48] sm:$0xff] }
 0x149   : > { %1408 = vmatpush.msrb.mxu0 %v1362_v23  ;;  %1448 = vmatpush.msrb.mxu2 %v1363_v24  ;;  %v1332_v23 = vld [vmem:[#allocation9 + $0x400] sm:$0xff]  ;;  %v1370_v24 = vld [vmem:[#allocation9 + $0x530] sm:$0xff] }
 0x14a   : > { %v1087_v30 = vld [vmem:[#allocation2 + $0x8] sm:$0xfe] }
 0x14b   : > { %1409 = vmatpush.msrb.mxu0 %v1360_v26  ;;  %1449 = vmatpush.msrb.mxu2 %v1361_v27  ;;  %v1089_v31 = vld [vmem:[#allocation2 + $0x18] sm:$0x1]  ;;  %v1162_v32 = vrot.slane %v1087_v30, 1  ;;  %v1021_v54 = vld [vmem:[#allocation2 + $0x8] sm:$0xff]  ;;  %v1401_v26 = vrot.slane %v1329_v18, 2  ;;  %v1557_v18 = vld [vmem:[#allocation14 + $0x178] sm:$0xff] }
 0x14c   : > { %v1163_v33 = vrot.slane %v1089_v31, 1  ;;  %v1333_v27 = vld [vmem:[#allocation9 + $0x408] sm:$0xff] }
 0x14d   : > { %1410 = vmatpush.msrb.mxu0 %v1358_v28  ;;  %1450 = vmatpush.msrb.mxu2 %v1359_v29  ;;  %v1371_v28 = vld [vmem:[#allocation9 + $0x538] sm:$0xff]  ;;  %v1368_v29 = vld [vmem:[#allocation9 + $0x520] sm:$0xff]  ;;  %v1369_v30 = vld [vmem:[#allocation9 + $0x528] sm:$0xff] }
 0x14e   : > { %v1164_v36 = vsel %vm649_vm1, %v1162_v32, %v1163_v33  ;;  %v1328_v31 = vld [vmem:[#allocation2 + $0x8] sm:$0xfc]  ;;  %v1330_v32 = vld [vmem:[#allocation2 + $0x18] sm:$0x3]  ;;  %v1402_v33 = vsel %vm891_vm2, %v1400_v25, %v1401_v26 }
 0x14f   : > { %1203 = vmatmul.f32.vlgmr.msrb.gmra.mxu1 %v1164_v36  ;;  %1243 = vmatmul.f32.vlgmr.msrb.gmra.mxu3 %v1164_v36  ;;  %v1403_v36 = vrot.slane %v1328_v31, 2  ;;  %v1515_v25 = vld [vmem:[#allocation14 + $0x28] sm:$0xff]  ;;  %v1513_v31 = vld [vmem:[#allocation14 + $0x18] sm:$0xff] }
 0x150   : > { %1411 = vmatpush.msrb.mxu0 %v1356_v34  ;;  %1428 = vmatpush.msrb.mxu1 %v1394_v35  ;;  %v1366_v34 = vld [vmem:[#allocation9 + $0x510] sm:$0xff]  ;;  %v1367_v35 = vld [vmem:[#allocation9 + $0x518] sm:$0xff] }
 0x151   : > { %1451 = vmatpush.msrb.mxu2 %v1357_v37  ;;  %1468 = vmatpush.msrb.mxu3 %v1395_v38  ;;  %v1404_v37 = vrot.slane %v1330_v32, 2  ;;  %v1364_v38 = vld [vmem:[#allocation9 + $0x500] sm:$0xff]  ;;  %v1551_v32 = vld [vmem:[#allocation14 + $0x148] sm:$0xff] }
 0x152   : > { %1263 = vmatmul.f32.vlgmr.msra.gmra.mxu0 %v1020_v41  ;;  %1303 = vmatmul.f32.vlgmr.msra.gmra.mxu2 %v1020_v41  ;;  %v1540_v41 = vld [vmem:[#allocation14 + $0xf0] sm:$0xff] }
 0x153   : > { %1412 = vmatpush.msrb.mxu0 %v1354_v39  ;;  %1429 = vmatpush.msrb.mxu1 %v1392_v40  ;;  %v1365_v39 = vld [vmem:[#allocation9 + $0x508] sm:$0xff]  ;;  %v1405_v40 = vsel %vm891_vm2, %v1403_v36, %v1404_v37  ;;  %v1549_v36 = vld [vmem:[#allocation14 + $0x138] sm:$0xff] }
 0x154   : > { %1452 = vmatpush.msrb.mxu2 %v1355_v42  ;;  %1469 = vmatpush.msrb.mxu3 %v1393_v43  ;;  %v1541_v42 = vld [vmem:[#allocation14 + $0xf8] sm:$0xff]  ;;  %v1538_v43 = vld [vmem:[#allocation14 + $0xe0] sm:$0xff] }
 0x155   : > { %1413 = vmatpush.msrb.mxu0 %v1352_v44  ;;  %1430 = vmatpush.msrb.mxu1 %v1390_v45  ;;  %v1539_v44 = vld [vmem:[#allocation14 + $0xe8] sm:$0xff]  ;;  %v1536_v45 = vld [vmem:[#allocation14 + $0xd0] sm:$0xff]  ;;  %v1546_v37 = vld [vmem:[#allocation14 + $0x120] sm:$0xff] }
 0x156   : > { %1453 = vmatpush.msrb.mxu2 %v1353_v46  ;;  %1470 = vmatpush.msrb.mxu3 %v1391_v47  ;;  %v1537_v46 = vld [vmem:[#allocation14 + $0xd8] sm:$0xff]  ;;  %v1534_v47 = vld [vmem:[#allocation14 + $0xc0] sm:$0xff] }
 0x157   : > { %1414 = vmatpush.msrb.mxu0 %v1350_v48  ;;  %1431 = vmatpush.msrb.mxu1 %v1388_v49  ;;  %v1572_v48 = vld [vmem:[#allocation14 + $0x1f0] sm:$0xff]  ;;  %v1535_v49 = vld [vmem:[#allocation14 + $0xc8] sm:$0xff] }
 0x158   : > { %1454 = vmatpush.msrb.mxu2 %v1351_v50  ;;  %1471 = vmatpush.msrb.mxu3 %v1389_v51  ;;  %v1573_v50 = vld [vmem:[#allocation14 + $0x1f8] sm:$0xff]  ;;  %v1532_v51 = vld [vmem:[#allocation14 + $0xb0] sm:$0xff] }
 0x159   : > { %1283 = vmatmul.f32.vlgmr.msra.gmra.mxu1 %v1021_v54  ;;  %1323 = vmatmul.f32.vlgmr.msra.gmra.mxu3 %v1021_v54  ;;  %v1571_v54 = vld [vmem:[#allocation14 + $0x1e8] sm:$0xff] }
 0x15a   : > { %1415 = vmatpush.msrb.mxu0 %v1348_v52  ;;  %1432 = vmatpush.msrb.mxu1 %v1386_v53  ;;  %v1570_v52 = vld [vmem:[#allocation14 + $0x1e0] sm:$0xff]  ;;  %v1533_v53 = vld [vmem:[#allocation14 + $0xb8] sm:$0xff] }
 0x15b   : > { %1455 = vmatpush.msrb.mxu2 %v1349_v55  ;;  %1472 = vmatpush.msrb.mxu3 %v1387_v56  ;;  %v1530_v55 = vld [vmem:[#allocation14 + $0xa0] sm:$0xff]  ;;  %v1568_v56 = vld [vmem:[#allocation14 + $0x1d0] sm:$0xff] }
 0x15c   : > { %1416 = vmatpush.msrb.mxu0 %v1346_v57  ;;  %1433 = vmatpush.msrb.mxu1 %v1384_v58  ;;  %v1531_v57 = vld [vmem:[#allocation14 + $0xa8] sm:$0xff]  ;;  %v1569_v58 = vld [vmem:[#allocation14 + $0x1d8] sm:$0xff] }
 0x15d   : > { %1456 = vmatpush.msrb.mxu2 %v1347_v59  ;;  %1473 = vmatpush.msrb.mxu3 %v1385_v60  ;;  %v1528_v59 = vld [vmem:[#allocation14 + $0x90] sm:$0xff]  ;;  %v1566_v60 = vld [vmem:[#allocation14 + $0x1c0] sm:$0xff] }
 0x15e   : > { %1417 = vmatpush.msrb.mxu0 %v1344_v61  ;;  %1434 = vmatpush.msrb.mxu1 %v1382_v62  ;;  %v1529_v61 = vld [vmem:[#allocation14 + $0x98] sm:$0xff]  ;;  %v1567_v62 = vld [vmem:[#allocation14 + $0x1c8] sm:$0xff] }
 0x15f   : > { %1457 = vmatpush.msrb.mxu2 %v1345_v63  ;;  %1474 = vmatpush.msrb.mxu3 %v1383_v0  ;;  %v1526_v63 = vld [vmem:[#allocation14 + $0x80] sm:$0xff]  ;;  %v1564_v0 = vld [vmem:[#allocation14 + $0x1b0] sm:$0xff] }
 0x160   : > { %1418 = vmatpush.msrb.mxu0 %v1342_v1  ;;  %1435 = vmatpush.msrb.mxu1 %v1380_v2  ;;  %v1527_v1 = vld [vmem:[#allocation14 + $0x88] sm:$0xff]  ;;  %v1565_v2 = vld [vmem:[#allocation14 + $0x1b8] sm:$0xff] }
 0x161   : > { %1458 = vmatpush.msrb.mxu2 %v1343_v3  ;;  %1475 = vmatpush.msrb.mxu3 %v1381_v4  ;;  %v1524_v3 = vld [vmem:[#allocation14 + $0x70] sm:$0xff]  ;;  %v1562_v4 = vld [vmem:[#allocation14 + $0x1a0] sm:$0xff] }
 0x162   : > { %1419 = vmatpush.msrb.mxu0 %v1340_v5  ;;  %1436 = vmatpush.msrb.mxu1 %v1378_v6  ;;  %v1525_v5 = vld [vmem:[#allocation14 + $0x78] sm:$0xff]  ;;  %v1563_v6 = vld [vmem:[#allocation14 + $0x1a8] sm:$0xff] }
 0x163   : > { %1459 = vmatpush.msrb.mxu2 %v1341_v7  ;;  %1476 = vmatpush.msrb.mxu3 %v1379_v8  ;;  %v1522_v7 = vld [vmem:[#allocation14 + $0x60] sm:$0xff]  ;;  %v1560_v8 = vld [vmem:[#allocation14 + $0x190] sm:$0xff] }
 0x164   : > { %1420 = vmatpush.msrb.mxu0 %v1338_v9  ;;  %1437 = vmatpush.msrb.mxu1 %v1376_v10  ;;  %v1523_v9 = vld [vmem:[#allocation14 + $0x68] sm:$0xff]  ;;  %v1561_v10 = vld [vmem:[#allocation14 + $0x198] sm:$0xff] }
 0x165   : > { %1460 = vmatpush.msrb.mxu2 %v1339_v11  ;;  %1477 = vmatpush.msrb.mxu3 %v1377_v12  ;;  %v1520_v11 = vld [vmem:[#allocation14 + $0x50] sm:$0xff]  ;;  %v1558_v12 = vld [vmem:[#allocation14 + $0x180] sm:$0xff] }
 0x166   : > { %1421 = vmatpush.msrb.mxu0 %v1336_v13  ;;  %1438 = vmatpush.msrb.mxu1 %v1374_v14  ;;  %v1521_v13 = vld [vmem:[#allocation14 + $0x58] sm:$0xff]  ;;  %v1559_v14 = vld [vmem:[#allocation14 + $0x188] sm:$0xff] }
 0x167   : > { %1461 = vmatpush.msrb.mxu2 %v1337_v15  ;;  %1478 = vmatpush.msrb.mxu3 %v1375_v16  ;;  %v1518_v15 = vld [vmem:[#allocation14 + $0x40] sm:$0xff]  ;;  %v1556_v16 = vld [vmem:[#allocation14 + $0x170] sm:$0xff] }
 0x168   : > { %1422 = vmatpush.msrb.mxu0 %v1334_v19  ;;  %1439 = vmatpush.msrb.mxu1 %v1372_v20  ;;  %v1516_v19 = vld [vmem:[#allocation14 + $0x30] sm:$0xff]  ;;  %v1554_v20 = vld [vmem:[#allocation14 + $0x160] sm:$0xff] }
 0x169   : > { %1462 = vmatpush.msrb.mxu2 %v1335_v21  ;;  %1479 = vmatpush.msrb.mxu3 %v1373_v22  ;;  %v1517_v21 = vld [vmem:[#allocation14 + $0x38] sm:$0xff]  ;;  %v1555_v22 = vld [vmem:[#allocation14 + $0x168] sm:$0xff] }
 0x16a   : > { %1423 = vmatpush.msrb.mxu0 %v1332_v23  ;;  %1440 = vmatpush.msrb.mxu1 %v1370_v24  ;;  %v1514_v23 = vld [vmem:[#allocation14 + $0x20] sm:$0xff]  ;;  %v1552_v24 = vld [vmem:[#allocation14 + $0x150] sm:$0xff] }
 0x16b   : > { %1463 = vmatpush.msrb.mxu2 %v1333_v27  ;;  %1480 = vmatpush.msrb.mxu3 %v1371_v28  ;;  %v1553_v28 = vld [vmem:[#allocation14 + $0x158] sm:$0xff] }
 0x16c   : > { %1424 = vmatmul.f32.vlgmr.msrb.gmra.mxu0 %v1402_v33  ;;  %1464 = vmatmul.f32.vlgmr.msrb.gmra.mxu2 %v1402_v33  ;;  %v1510_v33 = vld [vmem:[#allocation14] sm:$0xff] }
 0x16d   : > { %1441 = vmatpush.msrb.mxu1 %v1368_v29  ;;  %1481 = vmatpush.msrb.mxu3 %v1369_v30  ;;  %v1512_v29 = vld [vmem:[#allocation14 + $0x10] sm:$0xff]  ;;  %v1550_v30 = vld [vmem:[#allocation14 + $0x140] sm:$0xff] }
 0x16e   : > { %1574 = vmatpush.msra.mxu0 %v1540_v41  ;;  %1614 = vmatpush.msra.mxu2 %v1541_v42  ;;  %v1545_v42 = vld [vmem:[#allocation14 + $0x118] sm:$0xff] }
 0x16f   : > { %1442 = vmatpush.msrb.mxu1 %v1366_v34  ;;  %1482 = vmatpush.msrb.mxu3 %v1367_v35  ;;  %v1548_v34 = vld [vmem:[#allocation14 + $0x130] sm:$0xff]  ;;  %v1511_v35 = vld [vmem:[#allocation14 + $0x8] sm:$0xff] }
 0x170   : > { %1575 = vmatpush.msra.mxu0 %v1538_v43  ;;  %1615 = vmatpush.msra.mxu2 %v1539_v44  ;;  %v1542_v43 = vld [vmem:[#allocation14 + $0x100] sm:$0xff]  ;;  %v1543_v44 = vld [vmem:[#allocation14 + $0x108] sm:$0xff] }
 0x171   : > { %1443 = vmatpush.msrb.mxu1 %v1364_v38  ;;  %1483 = vmatpush.msrb.mxu3 %v1365_v39  ;;  %v1547_v38 = vld [vmem:[#allocation14 + $0x128] sm:$0xff]  ;;  %v1544_v39 = vld [vmem:[#allocation14 + $0x110] sm:$0xff] }
 0x172   : > { %1444 = vmatmul.f32.vlgmr.msrb.gmra.mxu1 %v1405_v40  ;;  %1484 = vmatmul.f32.vlgmr.msrb.gmra.mxu3 %v1405_v40 }
 0x173   : > { %1576 = vmatpush.msra.mxu0 %v1536_v45  ;;  %1616 = vmatpush.msra.mxu2 %v1537_v46 }
 0x174   : > { %1594 = vmatpush.msra.mxu1 %v1572_v48  ;;  %1634 = vmatpush.msra.mxu3 %v1573_v50  ;;  %v1490_v50 = vld [vmem:[%s2579_s4] sm:$0x3] }
 0x175   : > { %1577 = vmatpush.msra.mxu0 %v1534_v47  ;;  %1617 = vmatpush.msra.mxu2 %v1535_v49 }
 0x176   : > { %1595 = vmatpush.msra.mxu1 %v1570_v52  ;;  %1635 = vmatpush.msra.mxu3 %v1571_v54 }
 0x177   : > { %1578 = vmatpush.msra.mxu0 %v1532_v51  ;;  %1618 = vmatpush.msra.mxu2 %v1533_v53 }
 0x178   : > { %1596 = vmatpush.msra.mxu1 %v1568_v56  ;;  %1636 = vmatpush.msra.mxu3 %v1569_v58 }
 0x179   : > { %1579 = vmatpush.msra.mxu0 %v1530_v55  ;;  %1619 = vmatpush.msra.mxu2 %v1531_v57  ;;  %v1492_v57 = vperm.slane %v1490_v50, 0 }
 0x17a   : > { %1597 = vmatpush.msra.mxu1 %v1566_v60  ;;  %1637 = vmatpush.msra.mxu3 %v1567_v62 }
 0x17b   : > { %1580 = vmatpush.msra.mxu0 %v1528_v59  ;;  %1620 = vmatpush.msra.mxu2 %v1529_v61 }
 0x17c   : > { %1598 = vmatpush.msra.mxu1 %v1564_v0  ;;  %1638 = vmatpush.msra.mxu3 %v1565_v2  ;;  %v1493_v2 = vperm.slane %v1490_v50, 1 }
 0x17d   : > { %1581 = vmatpush.msra.mxu0 %v1526_v63  ;;  %1621 = vmatpush.msra.mxu2 %v1527_v1 }
 0x17e   : > { %1599 = vmatpush.msra.mxu1 %v1562_v4  ;;  %1639 = vmatpush.msra.mxu3 %v1563_v6 }
 0x17f   : > { %1582 = vmatpush.msra.mxu0 %v1524_v3  ;;  %1622 = vmatpush.msra.mxu2 %v1525_v5 }
 0x180   : > { %1600 = vmatpush.msra.mxu1 %v1560_v8  ;;  %1640 = vmatpush.msra.mxu3 %v1561_v10 }
 0x181   : > { %1583 = vmatpush.msra.mxu0 %v1522_v7  ;;  %1623 = vmatpush.msra.mxu2 %v1523_v9 }
 0x182   : > { %1601 = vmatpush.msra.mxu1 %v1558_v12  ;;  %1641 = vmatpush.msra.mxu3 %v1559_v14 }
 0x183   : > { %1584 = vmatpush.msra.mxu0 %v1520_v11  ;;  %1624 = vmatpush.msra.mxu2 %v1521_v13 }
 0x184   : > { %1602 = vmatpush.msra.mxu1 %v1556_v16  ;;  %1642 = vmatpush.msra.mxu3 %v1557_v18 }
 0x185   : > { %1585 = vmatpush.msra.mxu0 %v1518_v15  ;;  %1625 = vmatpush.msra.mxu2 %v1519_v17 }
 0x186   : > { %1603 = vmatpush.msra.mxu1 %v1554_v20  ;;  %1643 = vmatpush.msra.mxu3 %v1555_v22 }
 0x187   : > { %1586 = vmatpush.msra.mxu0 %v1516_v19  ;;  %1626 = vmatpush.msra.mxu2 %v1517_v21 }
 0x188   : > { %1604 = vmatpush.msra.mxu1 %v1552_v24  ;;  %1644 = vmatpush.msra.mxu3 %v1553_v28 }
 0x189   : > { %1587 = vmatpush.msra.mxu0 %v1514_v23  ;;  %1627 = vmatpush.msra.mxu2 %v1515_v25 }
 0x18a   : > { %1605 = vmatpush.msra.mxu1 %v1550_v30  ;;  %1645 = vmatpush.msra.mxu3 %v1551_v32 }
 0x18b   : > { %1588 = vmatpush.msra.mxu0 %v1512_v29  ;;  %1628 = vmatpush.msra.mxu2 %v1513_v31 }
 0x18c   : > { %1606 = vmatpush.msra.mxu1 %v1548_v34  ;;  %1646 = vmatpush.msra.mxu3 %v1549_v36 }
 0x18d   : > { %1589 = vmatpush.msra.mxu0 %v1510_v33  ;;  %1629 = vmatpush.msra.mxu2 %v1511_v35 }
 0x18e   : > { %1607 = vmatpush.msra.mxu1 %v1546_v37  ;;  %1647 = vmatpush.msra.mxu3 %v1547_v38 }
 0x190   : > { %1608 = vmatpush.msra.mxu1 %v1544_v39  ;;  %1648 = vmatpush.msra.mxu3 %v1545_v42 }
 0x192   : > { %1609 = vmatpush.msra.mxu1 %v1542_v43  ;;  %1649 = vmatpush.msra.mxu3 %v1543_v44 }
 0x1c5   : > { %v1184_v26 = vpop.f32.mrf.mxu0 }
 0x1cb   : > { %v1224_v40 = vpop.f32.mrf.mxu2 }
 0x1cc   : > { %v1204_v27 = vpop.f32.mrf.mxu1 }
 0x1cd   : > { %v1205_v47 = vadd.f32 %v1204_v27, %v1184_v26 }
 0x1cf   : > { %v1264_v45 = vpop.f32.mrf.mxu0 }
 0x1d0   : > { %v1265_v51 = vadd.f32 %v1264_v45, %v1205_v47 }
 0x1d2   : > { %v1244_v41 = vpop.f32.mrf.mxu3 }
 0x1d3   : > { %v1245_v54 = vadd.f32 %v1244_v41, %v1224_v40 }
 0x1d5   : > { %v1304_v48 = vpop.f32.mrf.mxu2 }
 0x1d6   : > { %v1284_v46 = vpop.f32.mrf.mxu1  ;;  %v1305_v59 = vadd.f32 %v1304_v48, %v1245_v54  ;;  %v1993_v54 = vld [vmem:[%s2491_s6 + $0x8] sm:$0xff] }
 0x1d7   : > { %v1285_v55 = vadd.f32 %v1284_v46, %v1265_v51 }
 0x1dc   : > { %v1324_v49 = vpop.f32.mrf.mxu3 }
 0x1dd   : > { %v1325_v63 = vadd.f32 %v1324_v49, %v1305_v59  ;;  %v1992_v49 = vld [vmem:[%s2491_s6] sm:$0xff] }
 0x1e9   : > { %v1425_v52 = vpop.f32.mrf.mxu0 }
 0x1ef   : > { %v1445_v53 = vpop.f32.mrf.mxu1  ;;  %v1465_v61 = vpop.f32.mrf.mxu2 }
 0x1f0   : > { %v1446_v56 = vadd.f32 %v1445_v53, %v1425_v52 }
 0x1f2   : > { %v1488_v58 = vadd.f32 %v1446_v56, %v1285_v55 }
 0x1f4   : > { %v2528_v60 = vadd.f32 %v1492_v57, %v1488_v58 }
 0x1f5   : > { %v1485_v62 = vpop.f32.mrf.mxu3 }
 0x1f6   : > { %v1498_v0 = vrot.slane %v2528_v60, 4  ;;  %v1486_v1 = vadd.f32 %v1485_v62, %v1465_v61 }
 0x1f8   : > { %v1499_v3 = vadd.f32 %v1498_v0, %v2528_v60  ;;  %v1489_v4 = vadd.f32 %v1486_v1, %v1325_v63 }
 0x1fa   : > { %v1500_v5 = vrot.slane %v1499_v3, 2  ;;  %v2532_v6 = vadd.f32 %v1493_v2, %v1489_v4 }
 0x1fc   : > { %v1504_v7 = vrot.slane %v2532_v6, 4  ;;  %v1501_v8 = vadd.f32 %v1500_v5, %v1499_v3 }
 0x1fe   : > { %v1505_v9 = vadd.f32 %v1504_v7, %v2532_v6  ;;  %v1502_v10 = vrot.slane %v1501_v8, 1 }
 0x200   : > { %v1506_v11 = vrot.slane %v1505_v9, 2  ;;  %v1503_v12 = vadd.f32 %v1502_v10, %v1501_v8 }
 0x202   : > { %1590 = vmatmul.f32.vlgmr.msra.gmra.mxu0 %v1503_v12  ;;  %1630 = vmatmul.f32.vlgmr.msra.gmra.mxu2 %v1503_v12  ;;  %v1507_v13 = vadd.f32 %v1506_v11, %v1505_v9 }
 0x204   : > { %v1508_v14 = vrot.slane %v1507_v13, 1 }
 0x206   : > { %v1509_v15 = vadd.f32 %v1508_v14, %v1507_v13 }
 0x208   : > { %1610 = vmatmul.f32.vlgmr.msra.gmra.mxu1 %v1509_v15  ;;  %1650 = vmatmul.f32.vlgmr.msra.gmra.mxu3 %v1509_v15 }
 0x27f   : > { %v1591_v16 = vpop.f32.mrf.mxu0 }
 0x285   : > { %v1611_v17 = vpop.f32.mrf.mxu1  ;;  %v1631_v20 = vpop.f32.mrf.mxu2 }
 0x286   : > { %v1612_v18 = vadd.f32 %v1611_v17, %v1591_v16 }
 0x288   : > { %v1865_v19 = vmul.f32 -1.442695, %v1612_v18 }
 0x28a   : > { %1984 = vpow2.f32 %v1865_v19 }
 0x28b   : > { %v1651_v21 = vpop.f32.mrf.mxu3 }
 0x28c   : > { %v1652_v22 = vadd.f32 %v1651_v21, %v1631_v20 }
 0x28e   : > { %v1866_v23 = vmul.f32 -1.442695, %v1652_v22 }
 0x290   : > { %v1985_v24 = vpop.eup %1984  ;;  %1986 = vpow2.f32 %v1866_v23 }
 0x291   : > { %v1660_v25 = vadd.f32 1.0, %v1985_v24 }
 0x293   : > { %1988 = vrcp.f32 %v1660_v25  ;;  %v1673_v31 = vand.u32 2147483648, %v1660_v25  ;;  %v1671_v33 = vand.u32 2147483647, %v1660_v25  ;;  %vm1667_vm4 = vweird.f32 %v1660_v25 }
 0x295   : > { %v1674_v37 = vor.u32 1.1754944e-38, %v1673_v31  ;;  %vm1672_vm6 = vcmp.eq.f32.partialorder %v1671_v33, 8.507059e+37 }
 0x296   : > { %v1987_v26 = vpop.eup %1986 }
 0x297   : > { %v1661_v27 = vadd.f32 1.0, %v1987_v26 }
 0x299   : > { %v1989_v28 = vpop.eup %1988  ;;  %1990 = vrcp.f32 %v1661_v27  ;;  %v1688_v40 = vand.u32 2147483648, %v1661_v27  ;;  %v1686_v43 = vand.u32 2147483647, %v1661_v27  ;;  %vm1682_vm8 = vweird.f32 %v1661_v27 }
 0x29a   : > { %v1663_v29 = vmul.f32 %v1989_v28, %v1660_v25  ;;  %vm1668_vm3 = vweird.f32 %v1989_v28 }
 0x29b   : > { %vm1669_vm5 = vmor %vm1667_vm4, %vm1668_vm3  ;;  %v1689_v47 = vor.u32 1.1754944e-38, %v1688_v40  ;;  %vm1687_vm10 = vcmp.eq.f32.partialorder %v1686_v43, 8.507059e+37 }
 0x29c   : > { %v1664_v30 = vsub.f32 1.0, %v1663_v29 }
 0x29e   : > { %v1665_v32 = vmul.f32 %v1989_v28, %v1664_v30 }
 0x29f   : > { %v1991_v34 = vpop.eup %1990 }
 0x2a0   : > { %v1666_v35 = vadd.f32 %v1989_v28, %v1665_v32  ;;  %v1678_v36 = vmul.f32 %v1991_v34, %v1661_v27  ;;  %vm1683_vm7 = vweird.f32 %v1991_v34 }
 0x2a1   : > { %vm1684_vm9 = vmor %vm1682_vm8, %vm1683_vm7 }
 0x2a2   : > { %v1670_v38 = vsel %vm1669_vm5, %v1989_v28, %v1666_v35  ;;  %v1679_v39 = vsub.f32 1.0, %v1678_v36 }
 0x2a3   : > { %v1675_v41 = vsel %vm1672_vm6, %v1674_v37, %v1670_v38 }
 0x2a4   : > { %v1680_v42 = vmul.f32 %v1991_v34, %v1679_v39  ;;  %v1692_v44 = vperm.slane %v1675_v41, 0 }
 0x2a6   : > { %v1681_v45 = vadd.f32 %v1991_v34, %v1680_v42  ;;  %v1694_v46 = vmul.f32 %v1692_v44, %v2528_v60 }
 0x2a8   : > { %v1685_v48 = vsel %vm1684_vm9, %v1991_v34, %v1681_v45  ;;  %v1696_v50 = vadd.f32 %v1992_v49, %v1694_v46 }
 0x2a9   : > { %v1690_v51 = vsel %vm1687_vm10, %v1689_v47, %v1685_v48 }
 0x2aa   : > { %v1693_v52 = vperm.slane %v1690_v51, 0  ;;  %1698 = vst [vmem:[%s470_s20] sm:$0xff] %v1696_v50 }
 0x2ac   : > { %v1695_v53 = vmul.f32 %v1693_v52, %v2532_v6 }
 0x2ae   : > { %v1697_v55 = vadd.f32 %v1993_v54, %v1695_v53 }
 0x2b0   : > { %1699 = vst [vmem:[%s470_s20 + $0x8] sm:$0xff] %v1697_v55 }
 0x2b1   : > { %2231 = shalt.err (!%p2228_p9)
}
 0x2b2   : > { %1900 = dma.vmem_to_hbm [thread:$0]  (%p2454_p4), %s1715_s1, 256, %s1717_s27, %s1701_s23  }
 0x2b3 PF: > { %s1728_s18 = sand.u32 1, %s2270_s13   ;;  %p2603_p10 = scmp.ge.s32.totalorder %s2282_s16, 2 }
 0x2b4   : > { %s1729_s6 = scalar_lea.sflag [#allocation5], %s1728_s18 }
 0x2b5   : > { %p1926_p13 = pnand %p2603_p10, %p2458_p6 }
 0x2b7   : > { %p1927_p11 = pneg %p1926_p13 }
 0x2b9   : > { %2265 = dma.done.wait (%p1927_p11), %s1729_s6, 256  }
 0x2ba   : > { %2267 = vsyncadd (%p1927_p11), %s1729_s6, 4294967040  ;;  %p26_p0 = scmp.ge.s32.totalorder %s2428_s19, 4   ;;  %s2604_s13 = smov %s2274_s14 }
 0x2bb   : > { %s2605_s14 = smov %s2278_s15  ;;  %s2606_s15 = smov %s2439_s26 }
 0x2bc   : > { %s2607_s16 = smov %s2428_s19  ;;  %28 = sbr.rel (!%p26_p0) target bundleno = 14 (0xe), region = 134 }
 0x2c1   :  { %1735 = vsyncpa [#allocation4], 1 }
 0x2c2   :  { %1737 = vsyncpa [#allocation4 + $0x1], 1 }
 0x2c3   :  { %1738 = vsyncpa [#allocation7], 1 }
 0x2c4   :  { %1739 = vsyncpa [#allocation10], 1 }
 0x2c5   :  { %1740 = vsyncpa [#allocation13], 1 }
 0x2c6   :  { %1741 = vsyncpa [#allocation5], 1 }
 0x2c7   :  { %1743 = vsyncpa [#allocation5 + $0x1], 1 }

</bundles_post_ra>
